<compile_context>
chip_gen: v7x
topology: tpu7x:2x2x1
jax: 0.10.0
libtpu: 0.0.40
codegen_flags: <defaults>
</compile_context>

<pallas_src>
import jax
import jax.numpy as jnp
from jax import lax
from jax.experimental import pallas as pl
from jax.experimental.pallas import tpu as pltpu


def _largest_divisor_leq(n, cap):
    cap = int(max(1, min(n, cap)))
    for d in range(cap, 0, -1):
        if n % d == 0:
            return d
    return 1


def _chip_budget():
    """(target input-tile bytes, vmem_limit_bytes), sized per TPU generation."""
    vmem = 64 * 1024 * 1024  # conservative default (v7x has 64 MiB / TensorCore)
    try:
        vmem = int(pltpu.get_tpu_info().vmem_capacity_bytes)
    except Exception:
        pass
    if vmem >= 128 * 1024 * 1024:               # v5e / v6e
        return 8 * 1024 * 1024, 64 * 1024 * 1024
    return 6 * 1024 * 1024, 48 * 1024 * 1024    # v7x: <=8 MiB/buffer, limit <= 48 MiB


def _pick_tiles(B, C, HW, itemsize, target_bytes):
    """Pick (Bt, Ct) so the per-step input tile is ~target_bytes while dividing
    B and C exactly and respecting the Mosaic (8,128) block constraint on the
    channel (second-to-last) block dim (Ct == C or Ct % 8 == 0)."""
    plane = HW * itemsize                       # one (H*W,) channel plane
    ct_cap = max(1, target_bytes // max(plane, 1))
    if C <= ct_cap:
        ct = C
    else:
        ct = None
        for d in range(int(min(C, ct_cap)), 0, -1):
            if C % d == 0 and d % 8 == 0:
                ct = d
                break
        if ct is None:
            # Rare (large C not 8-aligned): keep the full channel dim so the
            # block equals the array dim (correctness-safe).
            ct = C
    bt_cap = max(1, target_bytes // max(ct * plane, 1))
    if B >= 2:
        bt_cap = min(bt_cap, B // 2)            # keep >=2 blocks on the parallel axis
    bt = _largest_divisor_leq(B, bt_cap)
    return bt, ct


def _make_kernel(Bt, Ct, H, W, K, pad, HW, Lp):
    base = pad * W + pad                        # interior offset inside the flat padded buffer

    def kernel(x_ref, w_ref, mask_ref, o_ref, sum_a, max_a, pbuf):
        # x_ref   : (Bt, Ct, HW) VMEM    one channel chunk of Bt batch items (lane-dense)
        # w_ref   : (2*K*K,) SMEM f32    [w_avg * (1/C) | w_max], row-major taps
        # mask_ref: (K, HW)  VMEM f32    per-kw column-validity masks (constant block)
        # o_ref   : (Bt, 1, HW) VMEM     resident across the channel-chunk axis
        # sum_a, max_a: (Bt, HW) f32     lane-dense channel-sum / channel-max accumulators
        # pbuf    : (Bt, Lp) f32         flat buffer with `pad` zero rows above/below
        c = pl.program_id(1)
        nc = pl.num_programs(1)

        # ---- fused single-pass channel sum & max over this chunk (hot loop) ----
        x0 = x_ref[:, 0, :].astype(jnp.float32)                 # (Bt, HW)
        if Ct <= 16:
            s, m = x0, x0
            for i in range(1, Ct):
                xi = x_ref[:, i, :].astype(jnp.float32)
                s = s + xi
                m = jnp.maximum(m, xi)
        else:
            def body(i, carry):
                s_, m_ = carry
                xi = x_ref[:, i, :].astype(jnp.float32)
                return s_ + xi, jnp.maximum(m_, xi)
            s, m = lax.fori_loop(1, Ct, body, (x0, x0), unroll=8)

        @pl.when(c == 0)
        def _init():
            # Set, not accumulate-with-0 / max-with-0: all-negative inputs stay correct.
            sum_a[...] = s
            max_a[...] = m

        @pl.when(c > 0)
        def _accum():
            sum_a[...] = sum_a[...] + s
            max_a[...] = jnp.maximum(max_a[...], m)

        @pl.when(c == nc - 1)
        def _finalize():
            # Zero once; the interior is fully overwritten per source and the halo
            # stays zero (matches PyTorch's zero padding of the [avg, max] map).
            pbuf[...] = jnp.zeros_like(pbuf)
            acc = jnp.zeros((Bt, HW), jnp.float32)
            for ci, src in enumerate((sum_a, max_a)):
                # Place the map with `pad` zero rows above/below (flat layout).
                pbuf[:, base:base + HW] = src[...]
                for kw in range(K):
                    t = None
                    for kh in range(K):
                        wv = w_ref[ci * K * K + kh * K + kw]      # SMEM scalar tap
                        tap = wv * pbuf[:, kh * W + kw: kh * W + kw + HW]
                        t = tap if t is None else t + tap
                    # W-direction zero padding: mask out columns where the tap
                    # crossed a row boundary (applied once per (source, kw)).
                    acc = acc + mask_ref[kw:kw + 1, :] * t
            o_ref[:, 0, :] = jax.nn.sigmoid(acc).astype(o_ref.dtype)

    return kernel


def spatial_attention(x, weight, kernel_size=7):
    """x: (B, C, H, W) NCHW; weight: (1, 2, K, K) PyTorch conv weight, no bias."""
    B, C, H, W = x.shape
    K = int(kernel_size)
    # padding=K//2 gives 'same'-size output only for odd K (PyTorch default is 7).
    assert K % 2 == 1, "SpatialAttention kernel requires odd kernel_size"
    pad = K // 2
    HW = H * W
    Lp = (H + 2 * pad) * W + 2 * pad            # flat buffer: pad zero rows + pad slack each end

    target_bytes, vmem_limit = _chip_budget()
    Bt, Ct = _pick_tiles(B, C, HW, jnp.dtype(x.dtype).itemsize, target_bytes)
    num_b, num_c = B // Bt, C // Ct

    x_flat = x.reshape(B, C, HW)                # free collapse of contiguous NCHW dims

    # Flat SMEM weights; fold 1/C of the channel mean into the avg-channel taps
    # (conv is linear, so the kernel accumulates a raw f32 channel sum).
    w = weight.reshape(2, K, K).astype(jnp.float32)
    w_flat = jnp.concatenate([w[0] * (1.0 / C), w[1]], axis=0).reshape(2 * K * K)

    # Per-kw column-validity masks for the flattened (row-major) conv: flat index j
    # is column j % W; tap kw reads column (j % W) + kw - pad, valid iff in [0, W).
    col = jnp.arange(HW, dtype=jnp.int32) % W
    col_masks = jnp.stack(
        [((col + (kw - pad) >= 0) & (col + (kw - pad) < W)) for kw in range(K)],
        axis=0).astype(jnp.float32)             # (K, HW)

    kernel = _make_kernel(Bt, Ct, H, W, K, pad, HW, Lp)

    out = pl.pallas_call(
        kernel,
        out_shape=jax.ShapeDtypeStruct((B, 1, HW), x.dtype),
        grid_spec=pltpu.PrefetchScalarGridSpec(
            num_scalar_prefetch=0,
            grid=(num_b, num_c),                # reduction (channel-chunk) axis last
            in_specs=[
                pl.BlockSpec((Bt, Ct, HW), lambda b, c: (b, c, 0)),
                pl.BlockSpec(memory_space=pltpu.MemorySpace.SMEM),
                pl.BlockSpec((K, HW), lambda b, c: (0, 0)),   # constant block: DMA'd once
            ],
            out_specs=pl.BlockSpec((Bt, 1, HW), lambda b, c: (b, 0, 0)),
            scratch_shapes=[
                pltpu.VMEM((Bt, HW), jnp.float32),   # lane-dense channel-sum accumulator
                pltpu.VMEM((Bt, HW), jnp.float32),   # lane-dense channel-max accumulator
                pltpu.VMEM((Bt, Lp), jnp.float32),   # flat row-padded conv buffer
            ],
        ),
        compiler_params=pltpu.CompilerParams(
            dimension_semantics=("parallel", "arbitrary"),
            vmem_limit_bytes=vmem_limit,
        ),
    )(x_flat, w_flat, col_masks)

    return out.reshape(B, 1, H, W)


def spatial_attention_ref(x, weight):
    """Pure-JAX reference (mirrors the PyTorch forward) for verification."""
    avg = jnp.mean(x, axis=1, keepdims=True)
    mx = jnp.max(x, axis=1, keepdims=True)
    cat = jnp.concatenate([avg, mx], axis=1)    # (B, 2, H, W)
    out = jax.lax.conv_general_dilated(
        cat, weight,
        window_strides=(1, 1),
        padding="SAME",
        dimension_numbers=("NCHW", "OIHW", "NCHW"),
    )
    return jax.nn.sigmoid(out)


if __name__ == "__main__":
    key = jax.random.PRNGKey(0)
    kx, kw_key = jax.random.split(key)

    B, C, H, W = 2, 4, 16, 16
    K = 7

    x = jax.random.normal(kx, (B, C, H, W), dtype=jnp.float32)
    # Deterministic conv weight, PyTorch layout (out_c=1, in_c=2, K, K), no bias.
    fan_in = 2 * K * K
    bound = 1.0 / (fan_in ** 0.5)
    weight = jax.random.uniform(kw_key, (1, 2, K, K), dtype=jnp.float32,
                                minval=-bound, maxval=bound)

    out = jax.block_until_ready(spatial_attention(x, weight, kernel_size=K))
    ref = jax.block_until_ready(spatial_attention_ref(x, weight))

    assert out.shape == (B, 1, H, W)
    assert jnp.allclose(out, ref, atol=1e-5, rtol=1e-5), "mismatch vs reference"

    print("KERNEL_OK")
</pallas_src>

<mosaic_0001>
module attributes {stable_mosaic.version = 11 : i64} {
  func.func @kernel(%arg0: i32, %arg1: i32, %arg2: memref<1x4x256xf32, #tpu.memory_space<vmem>>, %arg3: memref<98xf32, #tpu.memory_space<smem>>, %arg4: memref<7x256xf32, #tpu.memory_space<vmem>>, %arg5: memref<1x1x256xf32, #tpu.memory_space<vmem>>, %arg6: memref<1x256xf32, #tpu.memory_space<vmem>>, %arg7: memref<1x256xf32, #tpu.memory_space<vmem>>, %arg8: memref<1x358xf32, #tpu.memory_space<vmem>>) attributes {dimension_semantics = [#tpu.dimension_semantics<parallel>, #tpu.dimension_semantics<arbitrary>], iteration_bounds = array<i64: 2, 1>, scalar_prefetch = 0 : i64, scratch_operands = 3 : i64, tpu.core_type = #tpu.core_type<tc>, window_params = [{transform_indices = @transform_0, window_bounds = array<i64: 1, 4, 256>}, {transform_indices = @transform_1, window_bounds = array<i64: 98>}, {pipeline_mode = #tpu.pipeline_mode<synchronous>, transform_indices = @transform_2, window_bounds = array<i64: 7, 256>}, {transform_indices = @transform_3, window_bounds = array<i64: 1, 1, 256>}]} {
    %c0 = arith.constant 0 : index
    %c0_0 = arith.constant 0 : index
    %c0_1 = arith.constant 0 : index
    %0 = vector.load %arg2[%c0, %c0_0, %c0_1] : memref<1x4x256xf32, #tpu.memory_space<vmem>>, vector<1x1x256xf32>
    %1 = vector.shape_cast %0 : vector<1x1x256xf32> to vector<1x256xf32>
    %c0_2 = arith.constant 0 : index
    %c1 = arith.constant 1 : index
    %c0_3 = arith.constant 0 : index
    %2 = vector.load %arg2[%c0_2, %c1, %c0_3] : memref<1x4x256xf32, #tpu.memory_space<vmem>>, vector<1x1x256xf32>
    %3 = vector.shape_cast %2 : vector<1x1x256xf32> to vector<1x256xf32>
    %4 = arith.addf %1, %3 : vector<1x256xf32>
    %5 = arith.maximumf %1, %3 : vector<1x256xf32>
    %c0_4 = arith.constant 0 : index
    %c2 = arith.constant 2 : index
    %c0_5 = arith.constant 0 : index
    %6 = vector.load %arg2[%c0_4, %c2, %c0_5] : memref<1x4x256xf32, #tpu.memory_space<vmem>>, vector<1x1x256xf32>
    %7 = vector.shape_cast %6 : vector<1x1x256xf32> to vector<1x256xf32>
    %8 = arith.addf %4, %7 : vector<1x256xf32>
    %9 = arith.maximumf %5, %7 : vector<1x256xf32>
    %c0_6 = arith.constant 0 : index
    %c3 = arith.constant 3 : index
    %c0_7 = arith.constant 0 : index
    %10 = vector.load %arg2[%c0_6, %c3, %c0_7] : memref<1x4x256xf32, #tpu.memory_space<vmem>>, vector<1x1x256xf32>
    %11 = vector.shape_cast %10 : vector<1x1x256xf32> to vector<1x256xf32>
    %12 = arith.addf %8, %11 : vector<1x256xf32>
    %13 = arith.maximumf %9, %11 : vector<1x256xf32>
    %c0_i32 = arith.constant 0 : i32
    %14 = arith.cmpi eq, %arg1, %c0_i32 : i32
    %15 = arith.extui %14 : i1 to i32
    %c0_i32_8 = arith.constant 0 : i32
    %16 = arith.cmpi ne, %15, %c0_i32_8 : i32
    scf.if %16 {
      %c0_13 = arith.constant 0 : index
      %c0_14 = arith.constant 0 : index
      %23 = vector.load %arg6[%c0_13, %c0_14] : memref<1x256xf32, #tpu.memory_space<vmem>>, vector<1x256xf32>
      tpu.vector_store %arg6[%c0_13, %c0_14], %12 {strides = array<i32>} : memref<1x256xf32, #tpu.memory_space<vmem>>, vector<1x256xf32>,
      %c0_15 = arith.constant 0 : index
      %c0_16 = arith.constant 0 : index
      %24 = vector.load %arg7[%c0_15, %c0_16] : memref<1x256xf32, #tpu.memory_space<vmem>>, vector<1x256xf32>
      tpu.vector_store %arg7[%c0_15, %c0_16], %13 {strides = array<i32>} : memref<1x256xf32, #tpu.memory_space<vmem>>, vector<1x256xf32>,
    } else {
    }
    %c0_i32_9 = arith.constant 0 : i32
    %17 = arith.cmpi sgt, %arg1, %c0_i32_9 : i32
    %18 = arith.extui %17 : i1 to i32
    %c0_i32_10 = arith.constant 0 : i32
    %19 = arith.cmpi ne, %18, %c0_i32_10 : i32
    scf.if %19 {
      %c0_13 = arith.constant 0 : index
      %c0_14 = arith.constant 0 : index
      %23 = vector.load %arg6[%c0_13, %c0_14] : memref<1x256xf32, #tpu.memory_space<vmem>>, vector<1x256xf32>
      %24 = arith.addf %23, %12 : vector<1x256xf32>
      %c0_15 = arith.constant 0 : index
      %c0_16 = arith.constant 0 : index
      %25 = vector.load %arg6[%c0_15, %c0_16] : memref<1x256xf32, #tpu.memory_space<vmem>>, vector<1x256xf32>
      tpu.vector_store %arg6[%c0_15, %c0_16], %24 {strides = array<i32>} : memref<1x256xf32, #tpu.memory_space<vmem>>, vector<1x256xf32>,
      %c0_17 = arith.constant 0 : index
      %c0_18 = arith.constant 0 : index
      %26 = vector.load %arg7[%c0_17, %c0_18] : memref<1x256xf32, #tpu.memory_space<vmem>>, vector<1x256xf32>
      %27 = arith.maximumf %26, %13 : vector<1x256xf32>
      %c0_19 = arith.constant 0 : index
      %c0_20 = arith.constant 0 : index
      %28 = vector.load %arg7[%c0_19, %c0_20] : memref<1x256xf32, #tpu.memory_space<vmem>>, vector<1x256xf32>
      tpu.vector_store %arg7[%c0_19, %c0_20], %27 {strides = array<i32>} : memref<1x256xf32, #tpu.memory_space<vmem>>, vector<1x256xf32>,
    } else {
    }
    %c0_i32_11 = arith.constant 0 : i32
    %20 = arith.cmpi eq, %arg1, %c0_i32_11 : i32
    %21 = arith.extui %20 : i1 to i32
    %c0_i32_12 = arith.constant 0 : i32
    %22 = arith.cmpi ne, %21, %c0_i32_12 : i32
    scf.if %22 {
      %cst = arith.constant 0.000000e+00 : f32
      %23 = vector.broadcast %cst : f32 to vector<1x358xf32>
      %c0_13 = arith.constant 0 : index
      %c0_14 = arith.constant 0 : index
      %24 = vector.load %arg8[%c0_13, %c0_14] : memref<1x358xf32, #tpu.memory_space<vmem>>, vector<1x358xf32>
      tpu.vector_store %arg8[%c0_13, %c0_14], %23 {strides = array<i32>} : memref<1x358xf32, #tpu.memory_space<vmem>>, vector<1x358xf32>,
      %cst_15 = arith.constant 0.000000e+00 : f32
      %25 = vector.broadcast %cst_15 : f32 to vector<1x256xf32>
      %c0_16 = arith.constant 0 : index
      %c0_17 = arith.constant 0 : index
      %26 = vector.load %arg6[%c0_16, %c0_17] : memref<1x256xf32, #tpu.memory_space<vmem>>, vector<1x256xf32>
      %c0_18 = arith.constant 0 : index
      %c51 = arith.constant 51 : index
      %27 = vector.load %arg8[%c0_18, %c51] : memref<1x358xf32, #tpu.memory_space<vmem>>, vector<1x256xf32>
      tpu.vector_store %arg8[%c0_18, %c51], %26 {strides = array<i32>} : memref<1x358xf32, #tpu.memory_space<vmem>>, vector<1x256xf32>,
      %c0_19 = arith.constant 0 : index
      %28 = memref.load %arg3[%c0_19] : memref<98xf32, #tpu.memory_space<smem>>
      %c0_20 = arith.constant 0 : index
      %c0_21 = arith.constant 0 : index
      %29 = vector.load %arg8[%c0_20, %c0_21] : memref<1x358xf32, #tpu.memory_space<vmem>>, vector<1x256xf32>
      %30 = vector.broadcast %28 : f32 to vector<1x256xf32>
      %31 = arith.mulf %30, %29 : vector<1x256xf32>
      %c7 = arith.constant 7 : index
      %32 = memref.load %arg3[%c7] : memref<98xf32, #tpu.memory_space<smem>>
      %c0_22 = arith.constant 0 : index
      %c16 = arith.constant 16 : index
      %33 = vector.load %arg8[%c0_22, %c16] : memref<1x358xf32, #tpu.memory_space<vmem>>, vector<1x256xf32>
      %34 = vector.broadcast %32 : f32 to vector<1x256xf32>
      %35 = arith.mulf %34, %33 : vector<1x256xf32>
      %36 = arith.addf %31, %35 : vector<1x256xf32>
      %c14 = arith.constant 14 : index
      %37 = memref.load %arg3[%c14] : memref<98xf32, #tpu.memory_space<smem>>
      %c0_23 = arith.constant 0 : index
      %c32 = arith.constant 32 : index
      %38 = vector.load %arg8[%c0_23, %c32] : memref<1x358xf32, #tpu.memory_space<vmem>>, vector<1x256xf32>
      %39 = vector.broadcast %37 : f32 to vector<1x256xf32>
      %40 = arith.mulf %39, %38 : vector<1x256xf32>
      %41 = arith.addf %36, %40 : vector<1x256xf32>
      %c21 = arith.constant 21 : index
      %42 = memref.load %arg3[%c21] : memref<98xf32, #tpu.memory_space<smem>>
      %c0_24 = arith.constant 0 : index
      %c48 = arith.constant 48 : index
      %43 = vector.load %arg8[%c0_24, %c48] : memref<1x358xf32, #tpu.memory_space<vmem>>, vector<1x256xf32>
      %44 = vector.broadcast %42 : f32 to vector<1x256xf32>
      %45 = arith.mulf %44, %43 : vector<1x256xf32>
      %46 = arith.addf %41, %45 : vector<1x256xf32>
      %c28 = arith.constant 28 : index
      %47 = memref.load %arg3[%c28] : memref<98xf32, #tpu.memory_space<smem>>
      %c0_25 = arith.constant 0 : index
      %c64 = arith.constant 64 : index
      %48 = vector.load %arg8[%c0_25, %c64] : memref<1x358xf32, #tpu.memory_space<vmem>>, vector<1x256xf32>
      %49 = vector.broadcast %47 : f32 to vector<1x256xf32>
      %50 = arith.mulf %49, %48 : vector<1x256xf32>
      %51 = arith.addf %46, %50 : vector<1x256xf32>
      %c35 = arith.constant 35 : index
      %52 = memref.load %arg3[%c35] : memref<98xf32, #tpu.memory_space<smem>>
      %c0_26 = arith.constant 0 : index
      %c80 = arith.constant 80 : index
      %53 = vector.load %arg8[%c0_26, %c80] : memref<1x358xf32, #tpu.memory_space<vmem>>, vector<1x256xf32>
      %54 = vector.broadcast %52 : f32 to vector<1x256xf32>
      %55 = arith.mulf %54, %53 : vector<1x256xf32>
      %56 = arith.addf %51, %55 : vector<1x256xf32>
      %c42 = arith.constant 42 : index
      %57 = memref.load %arg3[%c42] : memref<98xf32, #tpu.memory_space<smem>>
      %c0_27 = arith.constant 0 : index
      %c96 = arith.constant 96 : index
      %58 = vector.load %arg8[%c0_27, %c96] : memref<1x358xf32, #tpu.memory_space<vmem>>, vector<1x256xf32>
      %59 = vector.broadcast %57 : f32 to vector<1x256xf32>
      %60 = arith.mulf %59, %58 : vector<1x256xf32>
      %61 = arith.addf %56, %60 : vector<1x256xf32>
      %c0_28 = arith.constant 0 : index
      %c0_29 = arith.constant 0 : index
      %62 = vector.load %arg4[%c0_28, %c0_29] : memref<7x256xf32, #tpu.memory_space<vmem>>, vector<1x256xf32>
      %63 = arith.mulf %62, %61 : vector<1x256xf32>
      %64 = arith.addf %25, %63 : vector<1x256xf32>
      %c1_30 = arith.constant 1 : index
      %65 = memref.load %arg3[%c1_30] : memref<98xf32, #tpu.memory_space<smem>>
      %c0_31 = arith.constant 0 : index
      %c1_32 = arith.constant 1 : index
      %66 = vector.load %arg8[%c0_31, %c1_32] : memref<1x358xf32, #tpu.memory_space<vmem>>, vector<1x256xf32>
      %67 = vector.broadcast %65 : f32 to vector<1x256xf32>
      %68 = arith.mulf %67, %66 : vector<1x256xf32>
      %c8 = arith.constant 8 : index
      %69 = memref.load %arg3[%c8] : memref<98xf32, #tpu.memory_space<smem>>
      %c0_33 = arith.constant 0 : index
      %c17 = arith.constant 17 : index
      %70 = vector.load %arg8[%c0_33, %c17] : memref<1x358xf32, #tpu.memory_space<vmem>>, vector<1x256xf32>
      %71 = vector.broadcast %69 : f32 to vector<1x256xf32>
      %72 = arith.mulf %71, %70 : vector<1x256xf32>
      %73 = arith.addf %68, %72 : vector<1x256xf32>
      %c15 = arith.constant 15 : index
      %74 = memref.load %arg3[%c15] : memref<98xf32, #tpu.memory_space<smem>>
      %c0_34 = arith.constant 0 : index
      %c33 = arith.constant 33 : index
      %75 = vector.load %arg8[%c0_34, %c33] : memref<1x358xf32, #tpu.memory_space<vmem>>, vector<1x256xf32>
      %76 = vector.broadcast %74 : f32 to vector<1x256xf32>
      %77 = arith.mulf %76, %75 : vector<1x256xf32>
      %78 = arith.addf %73, %77 : vector<1x256xf32>
      %c22 = arith.constant 22 : index
      %79 = memref.load %arg3[%c22] : memref<98xf32, #tpu.memory_space<smem>>
      %c0_35 = arith.constant 0 : index
      %c49 = arith.constant 49 : index
      %80 = vector.load %arg8[%c0_35, %c49] : memref<1x358xf32, #tpu.memory_space<vmem>>, vector<1x256xf32>
      %81 = vector.broadcast %79 : f32 to vector<1x256xf32>
      %82 = arith.mulf %81, %80 : vector<1x256xf32>
      %83 = arith.addf %78, %82 : vector<1x256xf32>
      %c29 = arith.constant 29 : index
      %84 = memref.load %arg3[%c29] : memref<98xf32, #tpu.memory_space<smem>>
      %c0_36 = arith.constant 0 : index
      %c65 = arith.constant 65 : index
      %85 = vector.load %arg8[%c0_36, %c65] : memref<1x358xf32, #tpu.memory_space<vmem>>, vector<1x256xf32>
      %86 = vector.broadcast %84 : f32 to vector<1x256xf32>
      %87 = arith.mulf %86, %85 : vector<1x256xf32>
      %88 = arith.addf %83, %87 : vector<1x256xf32>
      %c36 = arith.constant 36 : index
      %89 = memref.load %arg3[%c36] : memref<98xf32, #tpu.memory_space<smem>>
      %c0_37 = arith.constant 0 : index
      %c81 = arith.constant 81 : index
      %90 = vector.load %arg8[%c0_37, %c81] : memref<1x358xf32, #tpu.memory_space<vmem>>, vector<1x256xf32>
      %91 = vector.broadcast %89 : f32 to vector<1x256xf32>
      %92 = arith.mulf %91, %90 : vector<1x256xf32>
      %93 = arith.addf %88, %92 : vector<1x256xf32>
      %c43 = arith.constant 43 : index
      %94 = memref.load %arg3[%c43] : memref<98xf32, #tpu.memory_space<smem>>
      %c0_38 = arith.constant 0 : index
      %c97 = arith.constant 97 : index
      %95 = vector.load %arg8[%c0_38, %c97] : memref<1x358xf32, #tpu.memory_space<vmem>>, vector<1x256xf32>
      %96 = vector.broadcast %94 : f32 to vector<1x256xf32>
      %97 = arith.mulf %96, %95 : vector<1x256xf32>
      %98 = arith.addf %93, %97 : vector<1x256xf32>
      %c1_39 = arith.constant 1 : index
      %c0_40 = arith.constant 0 : index
      %99 = vector.load %arg4[%c1_39, %c0_40] : memref<7x256xf32, #tpu.memory_space<vmem>>, vector<1x256xf32>
      %100 = arith.mulf %99, %98 : vector<1x256xf32>
      %101 = arith.addf %64, %100 : vector<1x256xf32>
      %c2_41 = arith.constant 2 : index
      %102 = memref.load %arg3[%c2_41] : memref<98xf32, #tpu.memory_space<smem>>
      %c0_42 = arith.constant 0 : index
      %c2_43 = arith.constant 2 : index
      %103 = vector.load %arg8[%c0_42, %c2_43] : memref<1x358xf32, #tpu.memory_space<vmem>>, vector<1x256xf32>
      %104 = vector.broadcast %102 : f32 to vector<1x256xf32>
      %105 = arith.mulf %104, %103 : vector<1x256xf32>
      %c9 = arith.constant 9 : index
      %106 = memref.load %arg3[%c9] : memref<98xf32, #tpu.memory_space<smem>>
      %c0_44 = arith.constant 0 : index
      %c18 = arith.constant 18 : index
      %107 = vector.load %arg8[%c0_44, %c18] : memref<1x358xf32, #tpu.memory_space<vmem>>, vector<1x256xf32>
      %108 = vector.broadcast %106 : f32 to vector<1x256xf32>
      %109 = arith.mulf %108, %107 : vector<1x256xf32>
      %110 = arith.addf %105, %109 : vector<1x256xf32>
      %c16_45 = arith.constant 16 : index
      %111 = memref.load %arg3[%c16_45] : memref<98xf32, #tpu.memory_space<smem>>
      %c0_46 = arith.constant 0 : index
      %c34 = arith.constant 34 : index
      %112 = vector.load %arg8[%c0_46, %c34] : memref<1x358xf32, #tpu.memory_space<vmem>>, vector<1x256xf32>
      %113 = vector.broadcast %111 : f32 to vector<1x256xf32>
      %114 = arith.mulf %113, %112 : vector<1x256xf32>
      %115 = arith.addf %110, %114 : vector<1x256xf32>
      %c23 = arith.constant 23 : index
      %116 = memref.load %arg3[%c23] : memref<98xf32, #tpu.memory_space<smem>>
      %c0_47 = arith.constant 0 : index
      %c50 = arith.constant 50 : index
      %117 = vector.load %arg8[%c0_47, %c50] : memref<1x358xf32, #tpu.memory_space<vmem>>, vector<1x256xf32>
      %118 = vector.broadcast %116 : f32 to vector<1x256xf32>
      %119 = arith.mulf %118, %117 : vector<1x256xf32>
      %120 = arith.addf %115, %119 : vector<1x256xf32>
      %c30 = arith.constant 30 : index
      %121 = memref.load %arg3[%c30] : memref<98xf32, #tpu.memory_space<smem>>
      %c0_48 = arith.constant 0 : index
      %c66 = arith.constant 66 : index
      %122 = vector.load %arg8[%c0_48, %c66] : memref<1x358xf32, #tpu.memory_space<vmem>>, vector<1x256xf32>
      %123 = vector.broadcast %121 : f32 to vector<1x256xf32>
      %124 = arith.mulf %123, %122 : vector<1x256xf32>
      %125 = arith.addf %120, %124 : vector<1x256xf32>
      %c37 = arith.constant 37 : index
      %126 = memref.load %arg3[%c37] : memref<98xf32, #tpu.memory_space<smem>>
      %c0_49 = arith.constant 0 : index
      %c82 = arith.constant 82 : index
      %127 = vector.load %arg8[%c0_49, %c82] : memref<1x358xf32, #tpu.memory_space<vmem>>, vector<1x256xf32>
      %128 = vector.broadcast %126 : f32 to vector<1x256xf32>
      %129 = arith.mulf %128, %127 : vector<1x256xf32>
      %130 = arith.addf %125, %129 : vector<1x256xf32>
      %c44 = arith.constant 44 : index
      %131 = memref.load %arg3[%c44] : memref<98xf32, #tpu.memory_space<smem>>
      %c0_50 = arith.constant 0 : index
      %c98 = arith.constant 98 : index
      %132 = vector.load %arg8[%c0_50, %c98] : memref<1x358xf32, #tpu.memory_space<vmem>>, vector<1x256xf32>
      %133 = vector.broadcast %131 : f32 to vector<1x256xf32>
      %134 = arith.mulf %133, %132 : vector<1x256xf32>
      %135 = arith.addf %130, %134 : vector<1x256xf32>
      %c2_51 = arith.constant 2 : index
      %c0_52 = arith.constant 0 : index
      %136 = vector.load %arg4[%c2_51, %c0_52] : memref<7x256xf32, #tpu.memory_space<vmem>>, vector<1x256xf32>
      %137 = arith.mulf %136, %135 : vector<1x256xf32>
      %138 = arith.addf %101, %137 : vector<1x256xf32>
      %c3_53 = arith.constant 3 : index
      %139 = memref.load %arg3[%c3_53] : memref<98xf32, #tpu.memory_space<smem>>
      %c0_54 = arith.constant 0 : index
      %c3_55 = arith.constant 3 : index
      %140 = vector.load %arg8[%c0_54, %c3_55] : memref<1x358xf32, #tpu.memory_space<vmem>>, vector<1x256xf32>
      %141 = vector.broadcast %139 : f32 to vector<1x256xf32>
      %142 = arith.mulf %141, %140 : vector<1x256xf32>
      %c10 = arith.constant 10 : index
      %143 = memref.load %arg3[%c10] : memref<98xf32, #tpu.memory_space<smem>>
      %c0_56 = arith.constant 0 : index
      %c19 = arith.constant 19 : index
      %144 = vector.load %arg8[%c0_56, %c19] : memref<1x358xf32, #tpu.memory_space<vmem>>, vector<1x256xf32>
      %145 = vector.broadcast %143 : f32 to vector<1x256xf32>
      %146 = arith.mulf %145, %144 : vector<1x256xf32>
      %147 = arith.addf %142, %146 : vector<1x256xf32>
      %c17_57 = arith.constant 17 : index
      %148 = memref.load %arg3[%c17_57] : memref<98xf32, #tpu.memory_space<smem>>
      %c0_58 = arith.constant 0 : index
      %c35_59 = arith.constant 35 : index
      %149 = vector.load %arg8[%c0_58, %c35_59] : memref<1x358xf32, #tpu.memory_space<vmem>>, vector<1x256xf32>
      %150 = vector.broadcast %148 : f32 to vector<1x256xf32>
      %151 = arith.mulf %150, %149 : vector<1x256xf32>
      %152 = arith.addf %147, %151 : vector<1x256xf32>
      %c24 = arith.constant 24 : index
      %153 = memref.load %arg3[%c24] : memref<98xf32, #tpu.memory_space<smem>>
      %c0_60 = arith.constant 0 : index
      %c51_61 = arith.constant 51 : index
      %154 = vector.load %arg8[%c0_60, %c51_61] : memref<1x358xf32, #tpu.memory_space<vmem>>, vector<1x256xf32>
      %155 = vector.broadcast %153 : f32 to vector<1x256xf32>
      %156 = arith.mulf %155, %154 : vector<1x256xf32>
      %157 = arith.addf %152, %156 : vector<1x256xf32>
      %c31 = arith.constant 31 : index
      %158 = memref.load %arg3[%c31] : memref<98xf32, #tpu.memory_space<smem>>
      %c0_62 = arith.constant 0 : index
      %c67 = arith.constant 67 : index
      %159 = vector.load %arg8[%c0_62, %c67] : memref<1x358xf32, #tpu.memory_space<vmem>>, vector<1x256xf32>
      %160 = vector.broadcast %158 : f32 to vector<1x256xf32>
      %161 = arith.mulf %160, %159 : vector<1x256xf32>
      %162 = arith.addf %157, %161 : vector<1x256xf32>
      %c38 = arith.constant 38 : index
      %163 = memref.load %arg3[%c38] : memref<98xf32, #tpu.memory_space<smem>>
      %c0_63 = arith.constant 0 : index
      %c83 = arith.constant 83 : index
      %164 = vector.load %arg8[%c0_63, %c83] : memref<1x358xf32, #tpu.memory_space<vmem>>, vector<1x256xf32>
      %165 = vector.broadcast %163 : f32 to vector<1x256xf32>
      %166 = arith.mulf %165, %164 : vector<1x256xf32>
      %167 = arith.addf %162, %166 : vector<1x256xf32>
      %c45 = arith.constant 45 : index
      %168 = memref.load %arg3[%c45] : memref<98xf32, #tpu.memory_space<smem>>
      %c0_64 = arith.constant 0 : index
      %c99 = arith.constant 99 : index
      %169 = vector.load %arg8[%c0_64, %c99] : memref<1x358xf32, #tpu.memory_space<vmem>>, vector<1x256xf32>
      %170 = vector.broadcast %168 : f32 to vector<1x256xf32>
      %171 = arith.mulf %170, %169 : vector<1x256xf32>
      %172 = arith.addf %167, %171 : vector<1x256xf32>
      %c3_65 = arith.constant 3 : index
      %c0_66 = arith.constant 0 : index
      %173 = vector.load %arg4[%c3_65, %c0_66] : memref<7x256xf32, #tpu.memory_space<vmem>>, vector<1x256xf32>
      %174 = arith.mulf %173, %172 : vector<1x256xf32>
      %175 = arith.addf %138, %174 : vector<1x256xf32>
      %c4 = arith.constant 4 : index
      %176 = memref.load %arg3[%c4] : memref<98xf32, #tpu.memory_space<smem>>
      %c0_67 = arith.constant 0 : index
      %c4_68 = arith.constant 4 : index
      %177 = vector.load %arg8[%c0_67, %c4_68] : memref<1x358xf32, #tpu.memory_space<vmem>>, vector<1x256xf32>
      %178 = vector.broadcast %176 : f32 to vector<1x256xf32>
      %179 = arith.mulf %178, %177 : vector<1x256xf32>
      %c11 = arith.constant 11 : index
      %180 = memref.load %arg3[%c11] : memref<98xf32, #tpu.memory_space<smem>>
      %c0_69 = arith.constant 0 : index
      %c20 = arith.constant 20 : index
      %181 = vector.load %arg8[%c0_69, %c20] : memref<1x358xf32, #tpu.memory_space<vmem>>, vector<1x256xf32>
      %182 = vector.broadcast %180 : f32 to vector<1x256xf32>
      %183 = arith.mulf %182, %181 : vector<1x256xf32>
      %184 = arith.addf %179, %183 : vector<1x256xf32>
      %c18_70 = arith.constant 18 : index
      %185 = memref.load %arg3[%c18_70] : memref<98xf32, #tpu.memory_space<smem>>
      %c0_71 = arith.constant 0 : index
      %c36_72 = arith.constant 36 : index
      %186 = vector.load %arg8[%c0_71, %c36_72] : memref<1x358xf32, #tpu.memory_space<vmem>>, vector<1x256xf32>
      %187 = vector.broadcast %185 : f32 to vector<1x256xf32>
      %188 = arith.mulf %187, %186 : vector<1x256xf32>
      %189 = arith.addf %184, %188 : vector<1x256xf32>
      %c25 = arith.constant 25 : index
      %190 = memref.load %arg3[%c25] : memref<98xf32, #tpu.memory_space<smem>>
      %c0_73 = arith.constant 0 : index
      %c52 = arith.constant 52 : index
      %191 = vector.load %arg8[%c0_73, %c52] : memref<1x358xf32, #tpu.memory_space<vmem>>, vector<1x256xf32>
      %192 = vector.broadcast %190 : f32 to vector<1x256xf32>
      %193 = arith.mulf %192, %191 : vector<1x256xf32>
      %194 = arith.addf %189, %193 : vector<1x256xf32>
      %c32_74 = arith.constant 32 : index
      %195 = memref.load %arg3[%c32_74] : memref<98xf32, #tpu.memory_space<smem>>
      %c0_75 = arith.constant 0 : index
      %c68 = arith.constant 68 : index
      %196 = vector.load %arg8[%c0_75, %c68] : memref<1x358xf32, #tpu.memory_space<vmem>>, vector<1x256xf32>
      %197 = vector.broadcast %195 : f32 to vector<1x256xf32>
      %198 = arith.mulf %197, %196 : vector<1x256xf32>
      %199 = arith.addf %194, %198 : vector<1x256xf32>
      %c39 = arith.constant 39 : index
      %200 = memref.load %arg3[%c39] : memref<98xf32, #tpu.memory_space<smem>>
      %c0_76 = arith.constant 0 : index
      %c84 = arith.constant 84 : index
      %201 = vector.load %arg8[%c0_76, %c84] : memref<1x358xf32, #tpu.memory_space<vmem>>, vector<1x256xf32>
      %202 = vector.broadcast %200 : f32 to vector<1x256xf32>
      %203 = arith.mulf %202, %201 : vector<1x256xf32>
      %204 = arith.addf %199, %203 : vector<1x256xf32>
      %c46 = arith.constant 46 : index
      %205 = memref.load %arg3[%c46] : memref<98xf32, #tpu.memory_space<smem>>
      %c0_77 = arith.constant 0 : index
      %c100 = arith.constant 100 : index
      %206 = vector.load %arg8[%c0_77, %c100] : memref<1x358xf32, #tpu.memory_space<vmem>>, vector<1x256xf32>
      %207 = vector.broadcast %205 : f32 to vector<1x256xf32>
      %208 = arith.mulf %207, %206 : vector<1x256xf32>
      %209 = arith.addf %204, %208 : vector<1x256xf32>
      %c4_78 = arith.constant 4 : index
      %c0_79 = arith.constant 0 : index
      %210 = vector.load %arg4[%c4_78, %c0_79] : memref<7x256xf32, #tpu.memory_space<vmem>>, vector<1x256xf32>
      %211 = arith.mulf %210, %209 : vector<1x256xf32>
      %212 = arith.addf %175, %211 : vector<1x256xf32>
      %c5 = arith.constant 5 : index
      %213 = memref.load %arg3[%c5] : memref<98xf32, #tpu.memory_space<smem>>
      %c0_80 = arith.constant 0 : index
      %c5_81 = arith.constant 5 : index
      %214 = vector.load %arg8[%c0_80, %c5_81] : memref<1x358xf32, #tpu.memory_space<vmem>>, vector<1x256xf32>
      %215 = vector.broadcast %213 : f32 to vector<1x256xf32>
      %216 = arith.mulf %215, %214 : vector<1x256xf32>
      %c12 = arith.constant 12 : index
      %217 = memref.load %arg3[%c12] : memref<98xf32, #tpu.memory_space<smem>>
      %c0_82 = arith.constant 0 : index
      %c21_83 = arith.constant 21 : index
      %218 = vector.load %arg8[%c0_82, %c21_83] : memref<1x358xf32, #tpu.memory_space<vmem>>, vector<1x256xf32>
      %219 = vector.broadcast %217 : f32 to vector<1x256xf32>
      %220 = arith.mulf %219, %218 : vector<1x256xf32>
      %221 = arith.addf %216, %220 : vector<1x256xf32>
      %c19_84 = arith.constant 19 : index
      %222 = memref.load %arg3[%c19_84] : memref<98xf32, #tpu.memory_space<smem>>
      %c0_85 = arith.constant 0 : index
      %c37_86 = arith.constant 37 : index
      %223 = vector.load %arg8[%c0_85, %c37_86] : memref<1x358xf32, #tpu.memory_space<vmem>>, vector<1x256xf32>
      %224 = vector.broadcast %222 : f32 to vector<1x256xf32>
      %225 = arith.mulf %224, %223 : vector<1x256xf32>
      %226 = arith.addf %221, %225 : vector<1x256xf32>
      %c26 = arith.constant 26 : index
      %227 = memref.load %arg3[%c26] : memref<98xf32, #tpu.memory_space<smem>>
      %c0_87 = arith.constant 0 : index
      %c53 = arith.constant 53 : index
      %228 = vector.load %arg8[%c0_87, %c53] : memref<1x358xf32, #tpu.memory_space<vmem>>, vector<1x256xf32>
      %229 = vector.broadcast %227 : f32 to vector<1x256xf32>
      %230 = arith.mulf %229, %228 : vector<1x256xf32>
      %231 = arith.addf %226, %230 : vector<1x256xf32>
      %c33_88 = arith.constant 33 : index
      %232 = memref.load %arg3[%c33_88] : memref<98xf32, #tpu.memory_space<smem>>
      %c0_89 = arith.constant 0 : index
      %c69 = arith.constant 69 : index
      %233 = vector.load %arg8[%c0_89, %c69] : memref<1x358xf32, #tpu.memory_space<vmem>>, vector<1x256xf32>
      %234 = vector.broadcast %232 : f32 to vector<1x256xf32>
      %235 = arith.mulf %234, %233 : vector<1x256xf32>
      %236 = arith.addf %231, %235 : vector<1x256xf32>
      %c40 = arith.constant 40 : index
      %237 = memref.load %arg3[%c40] : memref<98xf32, #tpu.memory_space<smem>>
      %c0_90 = arith.constant 0 : index
      %c85 = arith.constant 85 : index
      %238 = vector.load %arg8[%c0_90, %c85] : memref<1x358xf32, #tpu.memory_space<vmem>>, vector<1x256xf32>
      %239 = vector.broadcast %237 : f32 to vector<1x256xf32>
      %240 = arith.mulf %239, %238 : vector<1x256xf32>
      %241 = arith.addf %236, %240 : vector<1x256xf32>
      %c47 = arith.constant 47 : index
      %242 = memref.load %arg3[%c47] : memref<98xf32, #tpu.memory_space<smem>>
      %c0_91 = arith.constant 0 : index
      %c101 = arith.constant 101 : index
      %243 = vector.load %arg8[%c0_91, %c101] : memref<1x358xf32, #tpu.memory_space<vmem>>, vector<1x256xf32>
      %244 = vector.broadcast %242 : f32 to vector<1x256xf32>
      %245 = arith.mulf %244, %243 : vector<1x256xf32>
      %246 = arith.addf %241, %245 : vector<1x256xf32>
      %c5_92 = arith.constant 5 : index
      %c0_93 = arith.constant 0 : index
      %247 = vector.load %arg4[%c5_92, %c0_93] : memref<7x256xf32, #tpu.memory_space<vmem>>, vector<1x256xf32>
      %248 = arith.mulf %247, %246 : vector<1x256xf32>
      %249 = arith.addf %212, %248 : vector<1x256xf32>
      %c6 = arith.constant 6 : index
      %250 = memref.load %arg3[%c6] : memref<98xf32, #tpu.memory_space<smem>>
      %c0_94 = arith.constant 0 : index
      %c6_95 = arith.constant 6 : index
      %251 = vector.load %arg8[%c0_94, %c6_95] : memref<1x358xf32, #tpu.memory_space<vmem>>, vector<1x256xf32>
      %252 = vector.broadcast %250 : f32 to vector<1x256xf32>
      %253 = arith.mulf %252, %251 : vector<1x256xf32>
      %c13 = arith.constant 13 : index
      %254 = memref.load %arg3[%c13] : memref<98xf32, #tpu.memory_space<smem>>
      %c0_96 = arith.constant 0 : index
      %c22_97 = arith.constant 22 : index
      %255 = vector.load %arg8[%c0_96, %c22_97] : memref<1x358xf32, #tpu.memory_space<vmem>>, vector<1x256xf32>
      %256 = vector.broadcast %254 : f32 to vector<1x256xf32>
      %257 = arith.mulf %256, %255 : vector<1x256xf32>
      %258 = arith.addf %253, %257 : vector<1x256xf32>
      %c20_98 = arith.constant 20 : index
      %259 = memref.load %arg3[%c20_98] : memref<98xf32, #tpu.memory_space<smem>>
      %c0_99 = arith.constant 0 : index
      %c38_100 = arith.constant 38 : index
      %260 = vector.load %arg8[%c0_99, %c38_100] : memref<1x358xf32, #tpu.memory_space<vmem>>, vector<1x256xf32>
      %261 = vector.broadcast %259 : f32 to vector<1x256xf32>
      %262 = arith.mulf %261, %260 : vector<1x256xf32>
      %263 = arith.addf %258, %262 : vector<1x256xf32>
      %c27 = arith.constant 27 : index
      %264 = memref.load %arg3[%c27] : memref<98xf32, #tpu.memory_space<smem>>
      %c0_101 = arith.constant 0 : index
      %c54 = arith.constant 54 : index
      %265 = vector.load %arg8[%c0_101, %c54] : memref<1x358xf32, #tpu.memory_space<vmem>>, vector<1x256xf32>
      %266 = vector.broadcast %264 : f32 to vector<1x256xf32>
      %267 = arith.mulf %266, %265 : vector<1x256xf32>
      %268 = arith.addf %263, %267 : vector<1x256xf32>
      %c34_102 = arith.constant 34 : index
      %269 = memref.load %arg3[%c34_102] : memref<98xf32, #tpu.memory_space<smem>>
      %c0_103 = arith.constant 0 : index
      %c70 = arith.constant 70 : index
      %270 = vector.load %arg8[%c0_103, %c70] : memref<1x358xf32, #tpu.memory_space<vmem>>, vector<1x256xf32>
      %271 = vector.broadcast %269 : f32 to vector<1x256xf32>
      %272 = arith.mulf %271, %270 : vector<1x256xf32>
      %273 = arith.addf %268, %272 : vector<1x256xf32>
      %c41 = arith.constant 41 : index
      %274 = memref.load %arg3[%c41] : memref<98xf32, #tpu.memory_space<smem>>
      %c0_104 = arith.constant 0 : index
      %c86 = arith.constant 86 : index
      %275 = vector.load %arg8[%c0_104, %c86] : memref<1x358xf32, #tpu.memory_space<vmem>>, vector<1x256xf32>
      %276 = vector.broadcast %274 : f32 to vector<1x256xf32>
      %277 = arith.mulf %276, %275 : vector<1x256xf32>
      %278 = arith.addf %273, %277 : vector<1x256xf32>
      %c48_105 = arith.constant 48 : index
      %279 = memref.load %arg3[%c48_105] : memref<98xf32, #tpu.memory_space<smem>>
      %c0_106 = arith.constant 0 : index
      %c102 = arith.constant 102 : index
      %280 = vector.load %arg8[%c0_106, %c102] : memref<1x358xf32, #tpu.memory_space<vmem>>, vector<1x256xf32>
      %281 = vector.broadcast %279 : f32 to vector<1x256xf32>
      %282 = arith.mulf %281, %280 : vector<1x256xf32>
      %283 = arith.addf %278, %282 : vector<1x256xf32>
      %c6_107 = arith.constant 6 : index
      %c0_108 = arith.constant 0 : index
      %284 = vector.load %arg4[%c6_107, %c0_108] : memref<7x256xf32, #tpu.memory_space<vmem>>, vector<1x256xf32>
      %285 = arith.mulf %284, %283 : vector<1x256xf32>
      %286 = arith.addf %249, %285 : vector<1x256xf32>
      %c0_109 = arith.constant 0 : index
      %c0_110 = arith.constant 0 : index
      %287 = vector.load %arg7[%c0_109, %c0_110] : memref<1x256xf32, #tpu.memory_space<vmem>>, vector<1x256xf32>
      %c0_111 = arith.constant 0 : index
      %c51_112 = arith.constant 51 : index
      %288 = vector.load %arg8[%c0_111, %c51_112] : memref<1x358xf32, #tpu.memory_space<vmem>>, vector<1x256xf32>
      tpu.vector_store %arg8[%c0_111, %c51_112], %287 {strides = array<i32>} : memref<1x358xf32, #tpu.memory_space<vmem>>, vector<1x256xf32>,
      %c49_113 = arith.constant 49 : index
      %289 = memref.load %arg3[%c49_113] : memref<98xf32, #tpu.memory_space<smem>>
      %c0_114 = arith.constant 0 : index
      %c0_115 = arith.constant 0 : index
      %290 = vector.load %arg8[%c0_114, %c0_115] : memref<1x358xf32, #tpu.memory_space<vmem>>, vector<1x256xf32>
      %291 = vector.broadcast %289 : f32 to vector<1x256xf32>
      %292 = arith.mulf %291, %290 : vector<1x256xf32>
      %c56 = arith.constant 56 : index
      %293 = memref.load %arg3[%c56] : memref<98xf32, #tpu.memory_space<smem>>
      %c0_116 = arith.constant 0 : index
      %c16_117 = arith.constant 16 : index
      %294 = vector.load %arg8[%c0_116, %c16_117] : memref<1x358xf32, #tpu.memory_space<vmem>>, vector<1x256xf32>
      %295 = vector.broadcast %293 : f32 to vector<1x256xf32>
      %296 = arith.mulf %295, %294 : vector<1x256xf32>
      %297 = arith.addf %292, %296 : vector<1x256xf32>
      %c63 = arith.constant 63 : index
      %298 = memref.load %arg3[%c63] : memref<98xf32, #tpu.memory_space<smem>>
      %c0_118 = arith.constant 0 : index
      %c32_119 = arith.constant 32 : index
      %299 = vector.load %arg8[%c0_118, %c32_119] : memref<1x358xf32, #tpu.memory_space<vmem>>, vector<1x256xf32>
      %300 = vector.broadcast %298 : f32 to vector<1x256xf32>
      %301 = arith.mulf %300, %299 : vector<1x256xf32>
      %302 = arith.addf %297, %301 : vector<1x256xf32>
      %c70_120 = arith.constant 70 : index
      %303 = memref.load %arg3[%c70_120] : memref<98xf32, #tpu.memory_space<smem>>
      %c0_121 = arith.constant 0 : index
      %c48_122 = arith.constant 48 : index
      %304 = vector.load %arg8[%c0_121, %c48_122] : memref<1x358xf32, #tpu.memory_space<vmem>>, vector<1x256xf32>
      %305 = vector.broadcast %303 : f32 to vector<1x256xf32>
      %306 = arith.mulf %305, %304 : vector<1x256xf32>
      %307 = arith.addf %302, %306 : vector<1x256xf32>
      %c77 = arith.constant 77 : index
      %308 = memref.load %arg3[%c77] : memref<98xf32, #tpu.memory_space<smem>>
      %c0_123 = arith.constant 0 : index
      %c64_124 = arith.constant 64 : index
      %309 = vector.load %arg8[%c0_123, %c64_124] : memref<1x358xf32, #tpu.memory_space<vmem>>, vector<1x256xf32>
      %310 = vector.broadcast %308 : f32 to vector<1x256xf32>
      %311 = arith.mulf %310, %309 : vector<1x256xf32>
      %312 = arith.addf %307, %311 : vector<1x256xf32>
      %c84_125 = arith.constant 84 : index
      %313 = memref.load %arg3[%c84_125] : memref<98xf32, #tpu.memory_space<smem>>
      %c0_126 = arith.constant 0 : index
      %c80_127 = arith.constant 80 : index
      %314 = vector.load %arg8[%c0_126, %c80_127] : memref<1x358xf32, #tpu.memory_space<vmem>>, vector<1x256xf32>
      %315 = vector.broadcast %313 : f32 to vector<1x256xf32>
      %316 = arith.mulf %315, %314 : vector<1x256xf32>
      %317 = arith.addf %312, %316 : vector<1x256xf32>
      %c91 = arith.constant 91 : index
      %318 = memref.load %arg3[%c91] : memref<98xf32, #tpu.memory_space<smem>>
      %c0_128 = arith.constant 0 : index
      %c96_129 = arith.constant 96 : index
      %319 = vector.load %arg8[%c0_128, %c96_129] : memref<1x358xf32, #tpu.memory_space<vmem>>, vector<1x256xf32>
      %320 = vector.broadcast %318 : f32 to vector<1x256xf32>
      %321 = arith.mulf %320, %319 : vector<1x256xf32>
      %322 = arith.addf %317, %321 : vector<1x256xf32>
      %c0_130 = arith.constant 0 : index
      %c0_131 = arith.constant 0 : index
      %323 = vector.load %arg4[%c0_130, %c0_131] : memref<7x256xf32, #tpu.memory_space<vmem>>, vector<1x256xf32>
      %324 = arith.mulf %323, %322 : vector<1x256xf32>
      %325 = arith.addf %286, %324 : vector<1x256xf32>
      %c50_132 = arith.constant 50 : index
      %326 = memref.load %arg3[%c50_132] : memref<98xf32, #tpu.memory_space<smem>>
      %c0_133 = arith.constant 0 : index
      %c1_134 = arith.constant 1 : index
      %327 = vector.load %arg8[%c0_133, %c1_134] : memref<1x358xf32, #tpu.memory_space<vmem>>, vector<1x256xf32>
      %328 = vector.broadcast %326 : f32 to vector<1x256xf32>
      %329 = arith.mulf %328, %327 : vector<1x256xf32>
      %c57 = arith.constant 57 : index
      %330 = memref.load %arg3[%c57] : memref<98xf32, #tpu.memory_space<smem>>
      %c0_135 = arith.constant 0 : index
      %c17_136 = arith.constant 17 : index
      %331 = vector.load %arg8[%c0_135, %c17_136] : memref<1x358xf32, #tpu.memory_space<vmem>>, vector<1x256xf32>
      %332 = vector.broadcast %330 : f32 to vector<1x256xf32>
      %333 = arith.mulf %332, %331 : vector<1x256xf32>
      %334 = arith.addf %329, %333 : vector<1x256xf32>
      %c64_137 = arith.constant 64 : index
      %335 = memref.load %arg3[%c64_137] : memref<98xf32, #tpu.memory_space<smem>>
      %c0_138 = arith.constant 0 : index
      %c33_139 = arith.constant 33 : index
      %336 = vector.load %arg8[%c0_138, %c33_139] : memref<1x358xf32, #tpu.memory_space<vmem>>, vector<1x256xf32>
      %337 = vector.broadcast %335 : f32 to vector<1x256xf32>
      %338 = arith.mulf %337, %336 : vector<1x256xf32>
      %339 = arith.addf %334, %338 : vector<1x256xf32>
      %c71 = arith.constant 71 : index
      %340 = memref.load %arg3[%c71] : memref<98xf32, #tpu.memory_space<smem>>
      %c0_140 = arith.constant 0 : index
      %c49_141 = arith.constant 49 : index
      %341 = vector.load %arg8[%c0_140, %c49_141] : memref<1x358xf32, #tpu.memory_space<vmem>>, vector<1x256xf32>
      %342 = vector.broadcast %340 : f32 to vector<1x256xf32>
      %343 = arith.mulf %342, %341 : vector<1x256xf32>
      %344 = arith.addf %339, %343 : vector<1x256xf32>
      %c78 = arith.constant 78 : index
      %345 = memref.load %arg3[%c78] : memref<98xf32, #tpu.memory_space<smem>>
      %c0_142 = arith.constant 0 : index
      %c65_143 = arith.constant 65 : index
      %346 = vector.load %arg8[%c0_142, %c65_143] : memref<1x358xf32, #tpu.memory_space<vmem>>, vector<1x256xf32>
      %347 = vector.broadcast %345 : f32 to vector<1x256xf32>
      %348 = arith.mulf %347, %346 : vector<1x256xf32>
      %349 = arith.addf %344, %348 : vector<1x256xf32>
      %c85_144 = arith.constant 85 : index
      %350 = memref.load %arg3[%c85_144] : memref<98xf32, #tpu.memory_space<smem>>
      %c0_145 = arith.constant 0 : index
      %c81_146 = arith.constant 81 : index
      %351 = vector.load %arg8[%c0_145, %c81_146] : memref<1x358xf32, #tpu.memory_space<vmem>>, vector<1x256xf32>
      %352 = vector.broadcast %350 : f32 to vector<1x256xf32>
      %353 = arith.mulf %352, %351 : vector<1x256xf32>
      %354 = arith.addf %349, %353 : vector<1x256xf32>
      %c92 = arith.constant 92 : index
      %355 = memref.load %arg3[%c92] : memref<98xf32, #tpu.memory_space<smem>>
      %c0_147 = arith.constant 0 : index
      %c97_148 = arith.constant 97 : index
      %356 = vector.load %arg8[%c0_147, %c97_148] : memref<1x358xf32, #tpu.memory_space<vmem>>, vector<1x256xf32>
      %357 = vector.broadcast %355 : f32 to vector<1x256xf32>
      %358 = arith.mulf %357, %356 : vector<1x256xf32>
      %359 = arith.addf %354, %358 : vector<1x256xf32>
      %c1_149 = arith.constant 1 : index
      %c0_150 = arith.constant 0 : index
      %360 = vector.load %arg4[%c1_149, %c0_150] : memref<7x256xf32, #tpu.memory_space<vmem>>, vector<1x256xf32>
      %361 = arith.mulf %360, %359 : vector<1x256xf32>
      %362 = arith.addf %325, %361 : vector<1x256xf32>
      %c51_151 = arith.constant 51 : index
      %363 = memref.load %arg3[%c51_151] : memref<98xf32, #tpu.memory_space<smem>>
      %c0_152 = arith.constant 0 : index
      %c2_153 = arith.constant 2 : index
      %364 = vector.load %arg8[%c0_152, %c2_153] : memref<1x358xf32, #tpu.memory_space<vmem>>, vector<1x256xf32>
      %365 = vector.broadcast %363 : f32 to vector<1x256xf32>
      %366 = arith.mulf %365, %364 : vector<1x256xf32>
      %c58 = arith.constant 58 : index
      %367 = memref.load %arg3[%c58] : memref<98xf32, #tpu.memory_space<smem>>
      %c0_154 = arith.constant 0 : index
      %c18_155 = arith.constant 18 : index
      %368 = vector.load %arg8[%c0_154, %c18_155] : memref<1x358xf32, #tpu.memory_space<vmem>>, vector<1x256xf32>
      %369 = vector.broadcast %367 : f32 to vector<1x256xf32>
      %370 = arith.mulf %369, %368 : vector<1x256xf32>
      %371 = arith.addf %366, %370 : vector<1x256xf32>
      %c65_156 = arith.constant 65 : index
      %372 = memref.load %arg3[%c65_156] : memref<98xf32, #tpu.memory_space<smem>>
      %c0_157 = arith.constant 0 : index
      %c34_158 = arith.constant 34 : index
      %373 = vector.load %arg8[%c0_157, %c34_158] : memref<1x358xf32, #tpu.memory_space<vmem>>, vector<1x256xf32>
      %374 = vector.broadcast %372 : f32 to vector<1x256xf32>
      %375 = arith.mulf %374, %373 : vector<1x256xf32>
      %376 = arith.addf %371, %375 : vector<1x256xf32>
      %c72 = arith.constant 72 : index
      %377 = memref.load %arg3[%c72] : memref<98xf32, #tpu.memory_space<smem>>
      %c0_159 = arith.constant 0 : index
      %c50_160 = arith.constant 50 : index
      %378 = vector.load %arg8[%c0_159, %c50_160] : memref<1x358xf32, #tpu.memory_space<vmem>>, vector<1x256xf32>
      %379 = vector.broadcast %377 : f32 to vector<1x256xf32>
      %380 = arith.mulf %379, %378 : vector<1x256xf32>
      %381 = arith.addf %376, %380 : vector<1x256xf32>
      %c79 = arith.constant 79 : index
      %382 = memref.load %arg3[%c79] : memref<98xf32, #tpu.memory_space<smem>>
      %c0_161 = arith.constant 0 : index
      %c66_162 = arith.constant 66 : index
      %383 = vector.load %arg8[%c0_161, %c66_162] : memref<1x358xf32, #tpu.memory_space<vmem>>, vector<1x256xf32>
      %384 = vector.broadcast %382 : f32 to vector<1x256xf32>
      %385 = arith.mulf %384, %383 : vector<1x256xf32>
      %386 = arith.addf %381, %385 : vector<1x256xf32>
      %c86_163 = arith.constant 86 : index
      %387 = memref.load %arg3[%c86_163] : memref<98xf32, #tpu.memory_space<smem>>
      %c0_164 = arith.constant 0 : index
      %c82_165 = arith.constant 82 : index
      %388 = vector.load %arg8[%c0_164, %c82_165] : memref<1x358xf32, #tpu.memory_space<vmem>>, vector<1x256xf32>
      %389 = vector.broadcast %387 : f32 to vector<1x256xf32>
      %390 = arith.mulf %389, %388 : vector<1x256xf32>
      %391 = arith.addf %386, %390 : vector<1x256xf32>
      %c93 = arith.constant 93 : index
      %392 = memref.load %arg3[%c93] : memref<98xf32, #tpu.memory_space<smem>>
      %c0_166 = arith.constant 0 : index
      %c98_167 = arith.constant 98 : index
      %393 = vector.load %arg8[%c0_166, %c98_167] : memref<1x358xf32, #tpu.memory_space<vmem>>, vector<1x256xf32>
      %394 = vector.broadcast %392 : f32 to vector<1x256xf32>
      %395 = arith.mulf %394, %393 : vector<1x256xf32>
      %396 = arith.addf %391, %395 : vector<1x256xf32>
      %c2_168 = arith.constant 2 : index
      %c0_169 = arith.constant 0 : index
      %397 = vector.load %arg4[%c2_168, %c0_169] : memref<7x256xf32, #tpu.memory_space<vmem>>, vector<1x256xf32>
      %398 = arith.mulf %397, %396 : vector<1x256xf32>
      %399 = arith.addf %362, %398 : vector<1x256xf32>
      %c52_170 = arith.constant 52 : index
      %400 = memref.load %arg3[%c52_170] : memref<98xf32, #tpu.memory_space<smem>>
      %c0_171 = arith.constant 0 : index
      %c3_172 = arith.constant 3 : index
      %401 = vector.load %arg8[%c0_171, %c3_172] : memref<1x358xf32, #tpu.memory_space<vmem>>, vector<1x256xf32>
      %402 = vector.broadcast %400 : f32 to vector<1x256xf32>
      %403 = arith.mulf %402, %401 : vector<1x256xf32>
      %c59 = arith.constant 59 : index
      %404 = memref.load %arg3[%c59] : memref<98xf32, #tpu.memory_space<smem>>
      %c0_173 = arith.constant 0 : index
      %c19_174 = arith.constant 19 : index
      %405 = vector.load %arg8[%c0_173, %c19_174] : memref<1x358xf32, #tpu.memory_space<vmem>>, vector<1x256xf32>
      %406 = vector.broadcast %404 : f32 to vector<1x256xf32>
      %407 = arith.mulf %406, %405 : vector<1x256xf32>
      %408 = arith.addf %403, %407 : vector<1x256xf32>
      %c66_175 = arith.constant 66 : index
      %409 = memref.load %arg3[%c66_175] : memref<98xf32, #tpu.memory_space<smem>>
      %c0_176 = arith.constant 0 : index
      %c35_177 = arith.constant 35 : index
      %410 = vector.load %arg8[%c0_176, %c35_177] : memref<1x358xf32, #tpu.memory_space<vmem>>, vector<1x256xf32>
      %411 = vector.broadcast %409 : f32 to vector<1x256xf32>
      %412 = arith.mulf %411, %410 : vector<1x256xf32>
      %413 = arith.addf %408, %412 : vector<1x256xf32>
      %c73 = arith.constant 73 : index
      %414 = memref.load %arg3[%c73] : memref<98xf32, #tpu.memory_space<smem>>
      %c0_178 = arith.constant 0 : index
      %c51_179 = arith.constant 51 : index
      %415 = vector.load %arg8[%c0_178, %c51_179] : memref<1x358xf32, #tpu.memory_space<vmem>>, vector<1x256xf32>
      %416 = vector.broadcast %414 : f32 to vector<1x256xf32>
      %417 = arith.mulf %416, %415 : vector<1x256xf32>
      %418 = arith.addf %413, %417 : vector<1x256xf32>
      %c80_180 = arith.constant 80 : index
      %419 = memref.load %arg3[%c80_180] : memref<98xf32, #tpu.memory_space<smem>>
      %c0_181 = arith.constant 0 : index
      %c67_182 = arith.constant 67 : index
      %420 = vector.load %arg8[%c0_181, %c67_182] : memref<1x358xf32, #tpu.memory_space<vmem>>, vector<1x256xf32>
      %421 = vector.broadcast %419 : f32 to vector<1x256xf32>
      %422 = arith.mulf %421, %420 : vector<1x256xf32>
      %423 = arith.addf %418, %422 : vector<1x256xf32>
      %c87 = arith.constant 87 : index
      %424 = memref.load %arg3[%c87] : memref<98xf32, #tpu.memory_space<smem>>
      %c0_183 = arith.constant 0 : index
      %c83_184 = arith.constant 83 : index
      %425 = vector.load %arg8[%c0_183, %c83_184] : memref<1x358xf32, #tpu.memory_space<vmem>>, vector<1x256xf32>
      %426 = vector.broadcast %424 : f32 to vector<1x256xf32>
      %427 = arith.mulf %426, %425 : vector<1x256xf32>
      %428 = arith.addf %423, %427 : vector<1x256xf32>
      %c94 = arith.constant 94 : index
      %429 = memref.load %arg3[%c94] : memref<98xf32, #tpu.memory_space<smem>>
      %c0_185 = arith.constant 0 : index
      %c99_186 = arith.constant 99 : index
      %430 = vector.load %arg8[%c0_185, %c99_186] : memref<1x358xf32, #tpu.memory_space<vmem>>, vector<1x256xf32>
      %431 = vector.broadcast %429 : f32 to vector<1x256xf32>
      %432 = arith.mulf %431, %430 : vector<1x256xf32>
      %433 = arith.addf %428, %432 : vector<1x256xf32>
      %c3_187 = arith.constant 3 : index
      %c0_188 = arith.constant 0 : index
      %434 = vector.load %arg4[%c3_187, %c0_188] : memref<7x256xf32, #tpu.memory_space<vmem>>, vector<1x256xf32>
      %435 = arith.mulf %434, %433 : vector<1x256xf32>
      %436 = arith.addf %399, %435 : vector<1x256xf32>
      %c53_189 = arith.constant 53 : index
      %437 = memref.load %arg3[%c53_189] : memref<98xf32, #tpu.memory_space<smem>>
      %c0_190 = arith.constant 0 : index
      %c4_191 = arith.constant 4 : index
      %438 = vector.load %arg8[%c0_190, %c4_191] : memref<1x358xf32, #tpu.memory_space<vmem>>, vector<1x256xf32>
      %439 = vector.broadcast %437 : f32 to vector<1x256xf32>
      %440 = arith.mulf %439, %438 : vector<1x256xf32>
      %c60 = arith.constant 60 : index
      %441 = memref.load %arg3[%c60] : memref<98xf32, #tpu.memory_space<smem>>
      %c0_192 = arith.constant 0 : index
      %c20_193 = arith.constant 20 : index
      %442 = vector.load %arg8[%c0_192, %c20_193] : memref<1x358xf32, #tpu.memory_space<vmem>>, vector<1x256xf32>
      %443 = vector.broadcast %441 : f32 to vector<1x256xf32>
      %444 = arith.mulf %443, %442 : vector<1x256xf32>
      %445 = arith.addf %440, %444 : vector<1x256xf32>
      %c67_194 = arith.constant 67 : index
      %446 = memref.load %arg3[%c67_194] : memref<98xf32, #tpu.memory_space<smem>>
      %c0_195 = arith.constant 0 : index
      %c36_196 = arith.constant 36 : index
      %447 = vector.load %arg8[%c0_195, %c36_196] : memref<1x358xf32, #tpu.memory_space<vmem>>, vector<1x256xf32>
      %448 = vector.broadcast %446 : f32 to vector<1x256xf32>
      %449 = arith.mulf %448, %447 : vector<1x256xf32>
      %450 = arith.addf %445, %449 : vector<1x256xf32>
      %c74 = arith.constant 74 : index
      %451 = memref.load %arg3[%c74] : memref<98xf32, #tpu.memory_space<smem>>
      %c0_197 = arith.constant 0 : index
      %c52_198 = arith.constant 52 : index
      %452 = vector.load %arg8[%c0_197, %c52_198] : memref<1x358xf32, #tpu.memory_space<vmem>>, vector<1x256xf32>
      %453 = vector.broadcast %451 : f32 to vector<1x256xf32>
      %454 = arith.mulf %453, %452 : vector<1x256xf32>
      %455 = arith.addf %450, %454 : vector<1x256xf32>
      %c81_199 = arith.constant 81 : index
      %456 = memref.load %arg3[%c81_199] : memref<98xf32, #tpu.memory_space<smem>>
      %c0_200 = arith.constant 0 : index
      %c68_201 = arith.constant 68 : index
      %457 = vector.load %arg8[%c0_200, %c68_201] : memref<1x358xf32, #tpu.memory_space<vmem>>, vector<1x256xf32>
      %458 = vector.broadcast %456 : f32 to vector<1x256xf32>
      %459 = arith.mulf %458, %457 : vector<1x256xf32>
      %460 = arith.addf %455, %459 : vector<1x256xf32>
      %c88 = arith.constant 88 : index
      %461 = memref.load %arg3[%c88] : memref<98xf32, #tpu.memory_space<smem>>
      %c0_202 = arith.constant 0 : index
      %c84_203 = arith.constant 84 : index
      %462 = vector.load %arg8[%c0_202, %c84_203] : memref<1x358xf32, #tpu.memory_space<vmem>>, vector<1x256xf32>
      %463 = vector.broadcast %461 : f32 to vector<1x256xf32>
      %464 = arith.mulf %463, %462 : vector<1x256xf32>
      %465 = arith.addf %460, %464 : vector<1x256xf32>
      %c95 = arith.constant 95 : index
      %466 = memref.load %arg3[%c95] : memref<98xf32, #tpu.memory_space<smem>>
      %c0_204 = arith.constant 0 : index
      %c100_205 = arith.constant 100 : index
      %467 = vector.load %arg8[%c0_204, %c100_205] : memref<1x358xf32, #tpu.memory_space<vmem>>, vector<1x256xf32>
      %468 = vector.broadcast %466 : f32 to vector<1x256xf32>
      %469 = arith.mulf %468, %467 : vector<1x256xf32>
      %470 = arith.addf %465, %469 : vector<1x256xf32>
      %c4_206 = arith.constant 4 : index
      %c0_207 = arith.constant 0 : index
      %471 = vector.load %arg4[%c4_206, %c0_207] : memref<7x256xf32, #tpu.memory_space<vmem>>, vector<1x256xf32>
      %472 = arith.mulf %471, %470 : vector<1x256xf32>
      %473 = arith.addf %436, %472 : vector<1x256xf32>
      %c54_208 = arith.constant 54 : index
      %474 = memref.load %arg3[%c54_208] : memref<98xf32, #tpu.memory_space<smem>>
      %c0_209 = arith.constant 0 : index
      %c5_210 = arith.constant 5 : index
      %475 = vector.load %arg8[%c0_209, %c5_210] : memref<1x358xf32, #tpu.memory_space<vmem>>, vector<1x256xf32>
      %476 = vector.broadcast %474 : f32 to vector<1x256xf32>
      %477 = arith.mulf %476, %475 : vector<1x256xf32>
      %c61 = arith.constant 61 : index
      %478 = memref.load %arg3[%c61] : memref<98xf32, #tpu.memory_space<smem>>
      %c0_211 = arith.constant 0 : index
      %c21_212 = arith.constant 21 : index
      %479 = vector.load %arg8[%c0_211, %c21_212] : memref<1x358xf32, #tpu.memory_space<vmem>>, vector<1x256xf32>
      %480 = vector.broadcast %478 : f32 to vector<1x256xf32>
      %481 = arith.mulf %480, %479 : vector<1x256xf32>
      %482 = arith.addf %477, %481 : vector<1x256xf32>
      %c68_213 = arith.constant 68 : index
      %483 = memref.load %arg3[%c68_213] : memref<98xf32, #tpu.memory_space<smem>>
      %c0_214 = arith.constant 0 : index
      %c37_215 = arith.constant 37 : index
      %484 = vector.load %arg8[%c0_214, %c37_215] : memref<1x358xf32, #tpu.memory_space<vmem>>, vector<1x256xf32>
      %485 = vector.broadcast %483 : f32 to vector<1x256xf32>
      %486 = arith.mulf %485, %484 : vector<1x256xf32>
      %487 = arith.addf %482, %486 : vector<1x256xf32>
      %c75 = arith.constant 75 : index
      %488 = memref.load %arg3[%c75] : memref<98xf32, #tpu.memory_space<smem>>
      %c0_216 = arith.constant 0 : index
      %c53_217 = arith.constant 53 : index
      %489 = vector.load %arg8[%c0_216, %c53_217] : memref<1x358xf32, #tpu.memory_space<vmem>>, vector<1x256xf32>
      %490 = vector.broadcast %488 : f32 to vector<1x256xf32>
      %491 = arith.mulf %490, %489 : vector<1x256xf32>
      %492 = arith.addf %487, %491 : vector<1x256xf32>
      %c82_218 = arith.constant 82 : index
      %493 = memref.load %arg3[%c82_218] : memref<98xf32, #tpu.memory_space<smem>>
      %c0_219 = arith.constant 0 : index
      %c69_220 = arith.constant 69 : index
      %494 = vector.load %arg8[%c0_219, %c69_220] : memref<1x358xf32, #tpu.memory_space<vmem>>, vector<1x256xf32>
      %495 = vector.broadcast %493 : f32 to vector<1x256xf32>
      %496 = arith.mulf %495, %494 : vector<1x256xf32>
      %497 = arith.addf %492, %496 : vector<1x256xf32>
      %c89 = arith.constant 89 : index
      %498 = memref.load %arg3[%c89] : memref<98xf32, #tpu.memory_space<smem>>
      %c0_221 = arith.constant 0 : index
      %c85_222 = arith.constant 85 : index
      %499 = vector.load %arg8[%c0_221, %c85_222] : memref<1x358xf32, #tpu.memory_space<vmem>>, vector<1x256xf32>
      %500 = vector.broadcast %498 : f32 to vector<1x256xf32>
      %501 = arith.mulf %500, %499 : vector<1x256xf32>
      %502 = arith.addf %497, %501 : vector<1x256xf32>
      %c96_223 = arith.constant 96 : index
      %503 = memref.load %arg3[%c96_223] : memref<98xf32, #tpu.memory_space<smem>>
      %c0_224 = arith.constant 0 : index
      %c101_225 = arith.constant 101 : index
      %504 = vector.load %arg8[%c0_224, %c101_225] : memref<1x358xf32, #tpu.memory_space<vmem>>, vector<1x256xf32>
      %505 = vector.broadcast %503 : f32 to vector<1x256xf32>
      %506 = arith.mulf %505, %504 : vector<1x256xf32>
      %507 = arith.addf %502, %506 : vector<1x256xf32>
      %c5_226 = arith.constant 5 : index
      %c0_227 = arith.constant 0 : index
      %508 = vector.load %arg4[%c5_226, %c0_227] : memref<7x256xf32, #tpu.memory_space<vmem>>, vector<1x256xf32>
      %509 = arith.mulf %508, %507 : vector<1x256xf32>
      %510 = arith.addf %473, %509 : vector<1x256xf32>
      %c55 = arith.constant 55 : index
      %511 = memref.load %arg3[%c55] : memref<98xf32, #tpu.memory_space<smem>>
      %c0_228 = arith.constant 0 : index
      %c6_229 = arith.constant 6 : index
      %512 = vector.load %arg8[%c0_228, %c6_229] : memref<1x358xf32, #tpu.memory_space<vmem>>, vector<1x256xf32>
      %513 = vector.broadcast %511 : f32 to vector<1x256xf32>
      %514 = arith.mulf %513, %512 : vector<1x256xf32>
      %c62 = arith.constant 62 : index
      %515 = memref.load %arg3[%c62] : memref<98xf32, #tpu.memory_space<smem>>
      %c0_230 = arith.constant 0 : index
      %c22_231 = arith.constant 22 : index
      %516 = vector.load %arg8[%c0_230, %c22_231] : memref<1x358xf32, #tpu.memory_space<vmem>>, vector<1x256xf32>
      %517 = vector.broadcast %515 : f32 to vector<1x256xf32>
      %518 = arith.mulf %517, %516 : vector<1x256xf32>
      %519 = arith.addf %514, %518 : vector<1x256xf32>
      %c69_232 = arith.constant 69 : index
      %520 = memref.load %arg3[%c69_232] : memref<98xf32, #tpu.memory_space<smem>>
      %c0_233 = arith.constant 0 : index
      %c38_234 = arith.constant 38 : index
      %521 = vector.load %arg8[%c0_233, %c38_234] : memref<1x358xf32, #tpu.memory_space<vmem>>, vector<1x256xf32>
      %522 = vector.broadcast %520 : f32 to vector<1x256xf32>
      %523 = arith.mulf %522, %521 : vector<1x256xf32>
      %524 = arith.addf %519, %523 : vector<1x256xf32>
      %c76 = arith.constant 76 : index
      %525 = memref.load %arg3[%c76] : memref<98xf32, #tpu.memory_space<smem>>
      %c0_235 = arith.constant 0 : index
      %c54_236 = arith.constant 54 : index
      %526 = vector.load %arg8[%c0_235, %c54_236] : memref<1x358xf32, #tpu.memory_space<vmem>>, vector<1x256xf32>
      %527 = vector.broadcast %525 : f32 to vector<1x256xf32>
      %528 = arith.mulf %527, %526 : vector<1x256xf32>
      %529 = arith.addf %524, %528 : vector<1x256xf32>
      %c83_237 = arith.constant 83 : index
      %530 = memref.load %arg3[%c83_237] : memref<98xf32, #tpu.memory_space<smem>>
      %c0_238 = arith.constant 0 : index
      %c70_239 = arith.constant 70 : index
      %531 = vector.load %arg8[%c0_238, %c70_239] : memref<1x358xf32, #tpu.memory_space<vmem>>, vector<1x256xf32>
      %532 = vector.broadcast %530 : f32 to vector<1x256xf32>
      %533 = arith.mulf %532, %531 : vector<1x256xf32>
      %534 = arith.addf %529, %533 : vector<1x256xf32>
      %c90 = arith.constant 90 : index
      %535 = memref.load %arg3[%c90] : memref<98xf32, #tpu.memory_space<smem>>
      %c0_240 = arith.constant 0 : index
      %c86_241 = arith.constant 86 : index
      %536 = vector.load %arg8[%c0_240, %c86_241] : memref<1x358xf32, #tpu.memory_space<vmem>>, vector<1x256xf32>
      %537 = vector.broadcast %535 : f32 to vector<1x256xf32>
      %538 = arith.mulf %537, %536 : vector<1x256xf32>
      %539 = arith.addf %534, %538 : vector<1x256xf32>
      %c97_242 = arith.constant 97 : index
      %540 = memref.load %arg3[%c97_242] : memref<98xf32, #tpu.memory_space<smem>>
      %c0_243 = arith.constant 0 : index
      %c102_244 = arith.constant 102 : index
      %541 = vector.load %arg8[%c0_243, %c102_244] : memref<1x358xf32, #tpu.memory_space<vmem>>, vector<1x256xf32>
      %542 = vector.broadcast %540 : f32 to vector<1x256xf32>
      %543 = arith.mulf %542, %541 : vector<1x256xf32>
      %544 = arith.addf %539, %543 : vector<1x256xf32>
      %c6_245 = arith.constant 6 : index
      %c0_246 = arith.constant 0 : index
      %545 = vector.load %arg4[%c6_245, %c0_246] : memref<7x256xf32, #tpu.memory_space<vmem>>, vector<1x256xf32>
      %546 = arith.mulf %545, %544 : vector<1x256xf32>
      %547 = arith.addf %510, %546 : vector<1x256xf32>
      %548 = arith.negf %547 : vector<1x256xf32>
      %549 = math.exp %548 : vector<1x256xf32>
      %cst_247 = arith.constant 1.000000e+00 : f32
      %550 = vector.broadcast %cst_247 : f32 to vector<1x256xf32>
      %551 = arith.addf %550, %549 : vector<1x256xf32>
      %552 = arith.divf %550, %551 : vector<1x256xf32>
      %c0_248 = arith.constant 0 : index
      %c0_249 = arith.constant 0 : index
      %c0_250 = arith.constant 0 : index
      %553 = vector.load %arg5[%c0_248, %c0_249, %c0_250] : memref<1x1x256xf32, #tpu.memory_space<vmem>>, vector<1x1x256xf32>
      %554 = vector.shape_cast %553 : vector<1x1x256xf32> to vector<1x256xf32>
      %555 = vector.shape_cast %552 : vector<1x256xf32> to vector<1x1x256xf32>
      tpu.vector_store %arg5[%c0_248, %c0_249, %c0_250], %555 {strides = array<i32>} : memref<1x1x256xf32, #tpu.memory_space<vmem>>, vector<1x1x256xf32>,
    } else {
    }
    return
  }
  func.func @transform_0(%arg0: i32, %arg1: i32) -> (i32, i32, i32) {
    %c0_i32 = arith.constant 0 : i32
    %c0_i32_0 = arith.constant 0 : i32
    return %arg0, %arg1, %c0_i32 : i32, i32, i32
  }
  func.func @transform_1(%arg0: i32, %arg1: i32) -> i32 {
    %c0_i32 = arith.constant 0 : i32
    %c0_i32_0 = arith.constant 0 : i32
    return %c0_i32 : i32
  }
  func.func @transform_2(%arg0: i32, %arg1: i32) -> (i32, i32) {
    %c0_i32 = arith.constant 0 : i32
    %c0_i32_0 = arith.constant 0 : i32
    %c0_i32_1 = arith.constant 0 : i32
    return %c0_i32, %c0_i32_0 : i32, i32
  }
  func.func @transform_3(%arg0: i32, %arg1: i32) -> (i32, i32, i32) {
    %c0_i32 = arith.constant 0 : i32
    %c0_i32_0 = arith.constant 0 : i32
    %c0_i32_1 = arith.constant 0 : i32
    return %arg0, %c0_i32, %c0_i32_0 : i32, i32, i32
  }
}

</mosaic_0001>

<bundles_post_ra>
// kernel: tpu_custom_call.1
= control target key start
LH: loop header
LB: loop body
LE: loop exit
PB: predicated region body
PF: predicated region fallthrough
CT: control target
= control target key end

     0   :  { %8 = vsyncpa [#allocation6], 0  ;;  %s2613_s0 = inlined_call_operand.hbm [shape: f32[2,4,256], index: 0, kind: input, shape index: {}]   ;;  %s2614_s1 = inlined_call_operand.vmem [shape: f32[98], index: 1, kind: input, shape index: {}]   ;;  %s2615_s2 = inlined_call_operand.hbm [shape: f32[7,256], index: 2, kind: input, shape index: {}]   ;;  %s2616_s3 = inlined_call_operand.hbm [shape: f32[2,1,256], index: 3, kind: output, shape index: {}]  }
   0x1   :  { %10 = vsyncpa [#allocation6 + $0x1], 0 }
   0x2   :  { %11 = vsyncpa [#allocation8], 0 }
   0x3   :  { %12 = vsyncpa [#allocation11], 0 }
   0x4   :  { %13 = vsyncpa [#allocation7], 0 }
   0x5   :  { %15 = vsyncpa [#allocation7 + $0x1], 0  ;;  %s1867_s12 = smov 0   ;;  %s1869_s13 = smov 0  }
   0x6   :  { %s1871_s14 = smov 0   ;;  %s1873_s15 = smov 0  }
   0x7   :  { %s1875_s16 = smov 0   ;;  %s1877_s17 = smov 0  }
   0x8 LB: > { %s1440_s18 = sadd.s32 4294967295, %s1827_s17   ;;  %s1441_s19 = sadd.s32 4294967294, %s1827_s17   ;;  %s1827_s17 = sphi %s1877_s17, %s21_s17   ;;  %s1823_s16 = sphi %s1875_s16, %s2644_s16   ;;  %s1819_s15 = sphi %s1873_s15, %s2643_s15   ;;  %s1815_s14 = sphi %s1871_s14, %s2642_s14   ;;  %s1811_s13 = sphi %s1869_s13, %s2641_s13   ;;  %s1807_s12 = sphi %s1867_s12, %s2640_s12  }
   0x9   : > { %p55_p0 = scmp.ne.s32.totalorder %s1811_s13, %s1807_s12  ;;  %p1901_p1 = scmp.eq.s32.totalorder %s1440_s18, 0 }
   0xa   : > { %p1905_p2 = scmp.eq.s32.totalorder %s1440_s18, 1  ;;  %p127_p3 = scmp.eq.s32.totalorder %s1441_s19, 1 }
   0xb   : > { %s2621_s20 = scalar_select %p1901_p1, 1, 0 }
   0xc   : > { %p1911_p4 = por %p1901_p1, %p55_p0  ;;  %p1442_p5 = scmp.ge.s32.totalorder %s1827_s17, 1 }
   0xd   : > { %p1916_p6 = por %p127_p3, %p55_p0  ;;  %p134_p7 = scmp.lt.s32.totalorder %s1827_s17, 3 }
   0xe   : > { %s2623_s22 = scalar_select %p1911_p4, 1, 0 }
   0xf   : > { %s2624_s23 = scalar_select %p1916_p6, 1, 0 }
  0x10   : > { %s147_s26 = sshll.u32 %s2614_s1, 4  ;;  %p1924_p8 = pnand %p1442_p5, %p134_p7  ;;  %s148_s26 = int_to_ptr.vmem [resolvable:$true] %s147_s26 }
  0x11   : > { %s1829_s28 = smov [#allocation10]   ;;  %s1664_s4 = scalar_lea.vmem %s148_s26, 16 }
  0x12   : > { %p1574_p10 = pneg %p1924_p8  ;;  %s158_s29 = sshll.u32 %s1829_s28, 4  ;;  %s1937_s29 = int_to_ptr.vmem [resolvable:$true] %s158_s29 }
  0x13   : > { %p1665_p12 = scmp.ne.s32.totalorder %s148_s26, %s1664_s4  ;;  %p1672_p5 = scmp.lt.s32.totalorder %s148_s26, %s148_s26 }
  0x14   : > { %p1933_p11 = pnand %p1574_p10, %p1901_p1  ;;  %p1673_p7 = scmp.lt.s32.totalorder %s1664_s4, %s1664_s4 }
  0x16   : > { %p1666_p13 = pneg %p1933_p11  ;;  %p1674_p9 = por %p1673_p7, %p1672_p5 }
  0x18   : > { %p1667_p0 = pnand %p1666_p13, %p1665_p12 }
  0x1a   : > { %p1668_p3 = pneg %p1667_p0 }
  0x1c   : > { %p1675_p6 = pnand %p1674_p9, %p1668_p3 }
  0x1e   : > { %1678 = shalt.err (!%p1675_p6)
}
  0x1f   : > { %s1830_s5 = smov [#allocation9]   ;;  %s1679_s8 = scalar_lea.hbm %s2615_s2, 256 }
  0x20   : > { %1577 = dma.vmem_to_smem (!%p1933_p11), %s148_s26, 16, %s1830_s5, [#allocation8]  }
  0x21   : > { %p1680_p10 = scmp.ne.s32.totalorder %s2615_s2, %s1679_s8  ;;  %p1686_p6 = scmp.lt.u32.totalorder %s1679_s8, %s2615_s2 }
  0x23   : > { %p1682_p12 = pnand %p1680_p10, %p1666_p13 }
  0x25   : > { %p1683_p0 = pneg %p1682_p12 }
  0x27   : > { %p1688_p9 = pnand %p1686_p6, %p1683_p0 }
  0x29   : > { %1691 = shalt.err (!%p1688_p9)
}
  0x2a   : > { %s1692_s19 = scalar_lea.vmem %s1937_s29, 256  ;;  %p1700_p1 = scmp.lt.s32.totalorder %s1937_s29, %s1937_s29 }
  0x2b   : > { %p1693_p3 = scmp.ne.s32.totalorder %s1937_s29, %s1692_s19  ;;  %p1701_p10 = scmp.lt.s32.totalorder %s1692_s19, %s1692_s19 }
  0x2d   : > { %p1695_p5 = pnand %p1693_p3, %p1666_p13  ;;  %p1702_p12 = por %p1701_p10, %p1700_p1 }
  0x2f   : > { %p1696_p7 = pneg %p1695_p5 }
  0x31   : > { %p1703_p4 = pnand %p1702_p12, %p1696_p7 }
  0x33   : > { %1706 = shalt.err (!%p1703_p4)
}
  0x34   : > { %1580 = dma.hbm_to_vmem [thread:$0]  (!%p1933_p11), %s2615_s2, 256, %s1937_s29, [#allocation11]  }
  0x35   : > { %s33_s26 = sadd.s32 1, %s1823_s16  ;;  %s42_s28 = sadd.s32 1, %s1815_s14 }
  0x36   : > { %p35_p1 = scmp.ge.s32.totalorder %s33_s26, 2  ;;  %p49_p4 = scmp.ne.s32.totalorder %s1815_s14, %s1811_s13 }
  0x37   : > { %p50_p13 = scmp.eq.s32.totalorder %s1827_s17, 0  ;;  %p1591_p0 = scmp.lt.s32.totalorder %s1827_s17, 2 }
  0x38   : > { %s2646_s26 = smov (%p35_p1, %s33_s26), 0  ;;  %p1981_p9 = por %p1905_p2, %p49_p4 }
  0x39   : > { %p51_p6 = por %p50_p13, %p49_p4  ;;  %s37_s4 = ssub.s32 %s1823_s16, %s2646_s26 }
  0x3a   : > { %s2627_s30 = scalar_select %p1981_p9, 1, 0 }
  0x3b   : > { %s169_s5 = sand.u32 1, %s1815_s14   ;;  %p40_p3 = scmp.eq.s32.totalorder %s37_s4, 0 }
  0x3c   : > { %s1446_s29 = sshll.u32 %s169_s5, 3  ;;  %s1560_s6 = sshll.u32 %s1823_s16, 7 }
  0x3d   : > { %s1990_s7 = scalar_select %p40_p3, %s1815_s14, %s42_s28  }
  0x3e   : > { %s1995_s10 = scalar_lea.hbm %s2613_s0, %s1560_s6  ;;  %s173_s21 = scalar_lea.vmem [#allocation5], %s1446_s29 }
  0x3f   : > { %s183_s11 = sshll.u32 %s173_s21, 4  ;;  %p1999_p2 = pnand %p1591_p0, %p51_p6  ;;  %s2003_s11 = int_to_ptr.vmem [resolvable:$true] %s183_s11 }
  0x40   : > { %s170_s19 = scalar_lea.sflag [#allocation6], %s169_s5  ;;  %s1707_s24 = scalar_lea.hbm %s1995_s10, 128 }
  0x41   : > { %p1708_p11 = scmp.ne.s32.totalorder %s1995_s10, %s1707_s24  ;;  %p1709_p5 = pneg %p1999_p2 }
  0x42   : > { %s1712_s4 = scalar_lea.hbm %s2613_s0, 256  ;;  %p1713_p12 = scmp.lt.u32.totalorder %s1995_s10, %s2613_s0 }
  0x43   : > { %p1710_p7 = pnand %p1709_p5, %p1708_p11  ;;  %p1714_p1 = scmp.lt.u32.totalorder %s1712_s4, %s1707_s24 }
  0x44   : > { %p1716_p13 = scmp.lt.u32.totalorder %s1707_s24, %s1995_s10 }
  0x45   : > { %p1711_p10 = pneg %p1710_p7  ;;  %p1715_p4 = por %p1714_p1, %p1713_p12 }
  0x47   : > { %p1717_p0 = por %p1716_p13, %p1715_p4 }
  0x49   : > { %p1718_p6 = pnand %p1717_p0, %p1711_p10 }
  0x4b   : > { %1721 = shalt.err (!%p1718_p6)
}
  0x4c   : > { %s1722_s5 = scalar_lea.vmem %s2003_s11, 128  ;;  %s1831_s8 = smov [#allocation5]  }
  0x4d   : > { %p1723_p3 = scmp.ne.s32.totalorder %s2003_s11, %s1722_s5  ;;  %s1727_s9 = sshll.u32 %s1831_s8, 4  ;;  %s1728_s9 = int_to_ptr.vmem [resolvable:$false] %s1727_s9 }
  0x4e   : > { %s1729_s21 = scalar_lea.vmem %s1728_s9, 256  ;;  %p1730_p9 = scmp.lt.s32.totalorder %s2003_s11, %s1728_s9 }
  0x4f   : > { %p1725_p11 = pnand %p1723_p3, %p1709_p5  ;;  %p1731_p12 = scmp.lt.s32.totalorder %s1729_s21, %s1722_s5 }
  0x51   : > { %p1726_p7 = pneg %p1725_p11  ;;  %p1732_p1 = por %p1731_p12, %p1730_p9 }
  0x53   : > { %p1733_p4 = pnand %p1732_p1, %p1726_p7 }
  0x55   : > { %1736 = shalt.err (!%p1733_p4)
}
  0x56   : > { %1584 = dma.hbm_to_vmem [thread:$0]  (!%p1999_p2), %s1995_s10, 128, %s2003_s11, %s170_s19  }
  0x57   : > { %192 = sbr.rel (%p1924_p8) target bundleno = 675 (0x2a3), region = 32  ;;  %s2033_s24 = sand.u32 (!%p1924_p8), 1, %s1811_s13  }
  0x58   : > { %s1450_s25 = sshll.u32 (!%p1924_p8), %s2033_s24, 3  ;;  %s195_s28 = scalar_lea.sflag (!%p1924_p8), [#allocation6], %s2033_s24 }
  0x59   : > { %s198_s4 = scalar_lea.vmem (!%p1924_p8), [#allocation5], %s1450_s25  ;;  %p2629_p9 = scmp.ne.s32.totalorder (!%p1924_p8), %s2623_s22, 0 }
  0x5e   : > { %1790 = dma.done.wait (%p2629_p9), %s195_s28, 128  }
  0x5f   : > { %1792 = vsyncadd (%p2629_p9), %s195_s28, 4294967168  ;;  %p2630_p5 = scmp.ne.s32.totalorder %s2621_s20, 0 }
  0x61   : > { %1794 = dma.done.wait (%p2630_p5), [#allocation8], 16  }
  0x62   : > { %1796 = vsyncadd (%p2630_p5), [#allocation8], 4294967280 }
  0x63   : > { %1798 = dma.done.wait (%p2630_p5), [#allocation11], 256  }
  0x64   : > { %1800 = vsyncadd (%p2630_p5), [#allocation11], 4294967040 }
  0x65   : > { %211 = sfence }
  0x66   : > { %v230_v0 = vld [vmem:[%s198_s4] ss:$4 sm:$0x3]  ;;  %v1454_v1 = vld [vmem:[%s198_s4 + $0x1] ss:$4 sm:$0x3]  ;;  %v247_v2 = vlaneseq }
  0x67   : > { %v233_v3 = vadd.f32 %v1454_v1, %v230_v0  ;;  %v1455_v4 = vld [vmem:[%s198_s4 + $0x2] ss:$4 sm:$0x3]  ;;  %v234_v5 = vmax.f32 %v230_v0, %v1454_v1  ;;  %v1456_v6 = vld [vmem:[%s198_s4 + $0x3] ss:$4 sm:$0x3] }
  0x68   : > { %vm272_vm0 = vcmp.lt.s32.totalorder %v247_v2, 358  ;;  %v1832_v9 = vmov 0.0   ;;  %vm2049_vm1 = vcmp.lt.s32.totalorder %v247_v2, 256  ;;  %s1833_s20 = smov 51   ;;  %vm2057_vm2 = vcmp.ge.s32.totalorder %v247_v2, 51  ;;  %s1464_s22 = sld [smem:[#allocation9 + $0x8]] }
  0x69   : > { %v237_v7 = vadd.f32 %v1455_v4, %v233_v3  ;;  %v238_v8 = vmax.f32 %v234_v5, %v1455_v4  ;;  %274 = vst.msk [vmem:[#allocation4] sm:$0x7] %vm272_vm0, %v1832_v9  ;;  %vm2061_vm3 = vcmp.lt.s32.totalorder %v247_v2, 307  ;;  %vm280_vm4 = vcmask 416768   ;;  %s1457_s27 = sld [smem:[#allocation9 + $0x7]]  ;;  %s1471_s10 = sld [smem:[#allocation9 + $0x9]] }
  0x6a   : > { %vm285_vm5 = vmand %vm2057_vm2, %vm2061_vm3  ;;  %s1458_s11 = sld [smem:[#allocation9 + $0xe]]  ;;  %s1472_s18 = sld [smem:[#allocation9 + $0x10]]  ;;  %vm299_vm6 = vcmask 916480   ;;  %vm310_vm7 = vcmask 785408   ;;  %vm321_vm8 = vcmask 654336   ;;  %vm332_vm9 = vcmask 523264  }
  0x6b   : > { %v241_v11 = vadd.f32 %v1456_v6, %v237_v7  ;;  %v242_v12 = vmax.f32 %v238_v8, %v1456_v6  ;;  %s1465_s19 = sld [smem:[#allocation9 + $0xf]]  ;;  %s1467_s29 = sld [smem:[#allocation9 + $0x1d]]  ;;  %vm343_vm10 = vcmask 392192   ;;  %vm354_vm11 = vcmask 261120  }
  0x6c   : > { %s1466_s6 = sld [smem:[#allocation9 + $0x16]]  ;;  %s1834_s5 = smov 112   ;;  %vm430_vm12 = vcmask 1039360   ;;  %vm504_vm13 = vcmask 1031168   ;;  %vm578_vm14 = vcmask 1022976   ;;  %vm652_vm15 = vcmask 1014784  }
  0x6d   : > { %251 = vst.msk [vmem:[#allocation2] sm:$0x3] %vm2049_vm1, %v241_v11  ;;  %252 = vst.msk [vmem:[#allocation3] sm:$0x3] %vm2049_vm1, %v242_v12  ;;  %s1479_s8 = sld [smem:[#allocation9 + $0x11]]  ;;  %s1478_s9 = sld [smem:[#allocation9 + $0xa]] }
  0x6e   : > { %v365_v22 = vstv %s1464_s22  ;;  %s1835_s21 = smov 96   ;;  %s1468_s25 = sld [smem:[#allocation9 + $0x24]]  ;;  %vm726_vm0 = vcmask 1006592   ;;  %vm800_vm2 = vcmask 998400  }
  0x6f   : > { %v293_v23 = vstv %s1457_s27  ;;  %v439_v29 = vstv %s1471_s10  ;;  %s1473_s28 = sld [smem:[#allocation9 + $0x17]]  ;;  %s1480_s4 = sld [smem:[#allocation9 + $0x18]] }
  0x70   : > { %v304_v30 = vstv %s1458_s11  ;;  %v449_v33 = vstv %s1472_s18  ;;  %s1836_s22 = smov 64   ;;  %s1837_s27 = smov 80  }
  0x71   : > { %v375_v34 = vstv %s1465_s19  ;;  %v395_v37 = vstv %s1467_s29  ;;  %s1492_s10 = sld [smem:[#allocation9 + $0xc]]  ;;  %s1474_s11 = sld [smem:[#allocation9 + $0x1e]] }
  0x72   : > { %v385_v38 = vstv %s1466_s6  ;;  %s1475_s18 = sld [smem:[#allocation9 + $0x25]]  ;;  %s1486_s19 = sld [smem:[#allocation9 + $0x12]] }
  0x73   : > { %v523_v41 = vstv %s1479_s8  ;;  %v513_v42 = vstv %s1478_s9  ;;  %s1838_s29 = smov 48   ;;  %s1487_s6 = sld [smem:[#allocation9 + $0x19]] }
  0x74   : > { %v275_v13 = vld [vmem:[#allocation2] sm:$0x3]  ;;  %v805_v14 = vld [vmem:[#allocation3] sm:$0x3]  ;;  %v405_v45 = vstv %s1468_s25  ;;  %s1469_s8 = sld [smem:[#allocation9 + $0x2b]]  ;;  %s1499_s9 = sld [smem:[#allocation9 + $0xd]] }
  0x75   : > { %277 = vrot.lane.b32.xlu0 %v275_v13, %s1833_s20  ;;  %v459_v46 = vstv %s1473_s28  ;;  %v533_v49 = vstv %s1480_s4  ;;  %s1481_s25 = sld [smem:[#allocation9 + $0x1f]]  ;;  %s1482_s28 = sld [smem:[#allocation9 + $0x26]] }
  0x76   : > { %s1493_s4 = sld [smem:[#allocation9 + $0x13]]  ;;  %p2637_p2 = scmp.ne.s32.totalorder %s2627_s30, 0 }
  0x77   : > { %v661_v53 = vstv %s1492_s10  ;;  %v469_v54 = vstv %s1474_s11  ;;  %s1476_s10 = sld [smem:[#allocation9 + $0x2c]]  ;;  %s1839_s11 = smov 32  }
  0x78   : > { %v479_v57 = vstv %s1475_s18  ;;  %v597_v58 = vstv %s1486_s19  ;;  %s1483_s18 = sld [smem:[#allocation9 + $0x2d]]  ;;  %s1488_s19 = sld [smem:[#allocation9 + $0x20]] }
  0x79   : > { %807 = vrot.lane.b32.xlu0 %v805_v14, %s1833_s20  ;;  %s1485_s20 = sld [smem:[#allocation9 + $0xb]]  ;;  %v607_v61 = vstv %s1487_s6  ;;  %s1495_s6 = sld [smem:[#allocation9 + $0x21]] }
  0x7a   : > { %v415_v62 = vstv %s1469_s8  ;;  %v735_v1 = vstv %s1499_s9  ;;  %s1500_s8 = sld [smem:[#allocation9 + $0x14]]  ;;  %s1496_s9 = sld [smem:[#allocation9 + $0x28]] }
  0x7b   : > { %v543_v2 = vstv %s1481_s25  ;;  %v553_v5 = vstv %s1482_s28  ;;  %s1489_s25 = sld [smem:[#allocation9 + $0x27]] }
  0x7c   : > { %v671_v6 = vstv %s1493_s4  ;;  %s1497_s28 = sld [smem:[#allocation9 + $0x2f]]  ;;  %s1501_s4 = sld [smem:[#allocation9 + $0x1b]] }
  0x7d   : > { %v489_v11 = vstv %s1476_s10  ;;  %s1490_s10 = sld [smem:[#allocation9 + $0x2e]] }
  0x7e   : > { %v563_v14 = vstv %s1483_s18  ;;  %v617_v15 = vstv %s1488_s19  ;;  %s1514_s18 = sld [smem:[#allocation9 + $0x40]]  ;;  %s1502_s19 = sld [smem:[#allocation9 + $0x22]] }
  0x7f   : > { %v587_v50 = vstv %s1485_s20  ;;  %s1494_s20 = sld [smem:[#allocation9 + $0x1a]] }
  0x85   : > { %v681_v9 = vstv %s1494_s20  ;;  %s1513_s20 = sld [smem:[#allocation9 + $0x39]] }
  0xe7   : > { %v278_v17 = vpop.permute.xlu0 %277 }
  0xe8   : > { %v279_v18 = vrot.slane %v278_v17, 7 }
  0xea   : > { %v281_v19 = vsel %vm280_vm4, %v279_v18, %v278_v17  ;;  %v691_v18 = vstv %s1495_s6  ;;  %s1503_s6 = sld [smem:[#allocation9 + $0x29]] }
  0xeb   : > { %286 = vst.msk [vmem:[#allocation4] sm:$0x7] %vm285_vm5, %v281_v19  ;;  %v808_v20 = vpop.permute.xlu0 %807  ;;  %v745_v19 = vstv %s1500_s8  ;;  %s1515_s8 = sld [smem:[#allocation9 + $0x47]] }
  0xec   : > { %v809_v21 = vrot.slane %v808_v20, 7 }
  0xee   : > { %v810_v24 = vsel %vm280_vm4, %v809_v21, %v808_v20 }
  0xf2   : > { %v2076_v25 = vld [vmem:[#allocation4] sm:$0x7] }
  0xf3   : > { %v2078_v26 = vld [vmem:[#allocation4] sm:$0x3]  ;;  %v366_v27 = vmul.f32 %v365_v22, %v2076_v25  ;;  %v294_v28 = vmul.f32 %v293_v23, %v2076_v25  ;;  %v440_v31 = vmul.f32 %v439_v29, %v2076_v25  ;;  %v305_v32 = vmul.f32 %v304_v30, %v2076_v25 }
  0xf4   : > { %812 = vst.msk [vmem:[#allocation4] sm:$0x7] %vm285_vm5, %v810_v24  ;;  %v450_v35 = vmul.f32 %v449_v33, %v2076_v25  ;;  %v376_v36 = vmul.f32 %v375_v34, %v2076_v25  ;;  %v396_v39 = vmul.f32 %v395_v37, %v2076_v25  ;;  %v386_v40 = vmul.f32 %v385_v38, %v2076_v25 }
  0xf5   : > { %368 = vrot.lane.b32.xlu0 %v366_v27, %s1834_s5  ;;  %296 = vrot.lane.b32.xlu1 %v294_v28, %s1834_s5  ;;  %v524_v43 = vmul.f32 %v523_v41, %v2076_v25  ;;  %v514_v44 = vmul.f32 %v513_v42, %v2076_v25  ;;  %v406_v47 = vmul.f32 %v405_v45, %v2076_v25  ;;  %v701_v22 = vstv %s1496_s9  ;;  %s1504_s9 = sld [smem:[#allocation9 + $0x30]] }
  0xf6   : > { %v460_v48 = vmul.f32 %v459_v46, %v2076_v25  ;;  %v534_v51 = vmul.f32 %v533_v49, %v2076_v25  ;;  %v588_v52 = vmul.f32 %v587_v50, %v2076_v25  ;;  %v662_v55 = vmul.f32 %v661_v53, %v2076_v25 }
  0xf7   : > { %v470_v56 = vmul.f32 %v469_v54, %v2076_v25  ;;  %v480_v59 = vmul.f32 %v479_v57, %v2076_v25  ;;  %v598_v60 = vmul.f32 %v597_v58, %v2076_v25  ;;  %v608_v63 = vmul.f32 %v607_v61, %v2076_v25 }
  0xf8   : > { %v416_v0 = vmul.f32 %v415_v62, %v2076_v25  ;;  %v736_v3 = vmul.f32 %v735_v1, %v2076_v25  ;;  %v544_v4 = vmul.f32 %v543_v2, %v2076_v25  ;;  %v554_v7 = vmul.f32 %v553_v5, %v2076_v25 }
  0xf9   : > { %442 = vrot.lane.b32.xlu0 %v440_v31, %s1834_s5  ;;  %307 = vrot.lane.b32.xlu1 %v305_v32, %s1835_s21  ;;  %v672_v8 = vmul.f32 %v671_v6, %v2076_v25  ;;  %v682_v12 = vmul.f32 %v681_v9, %v2076_v25  ;;  %v490_v13 = vmul.f32 %v489_v11, %v2076_v25  ;;  %v627_v23 = vstv %s1489_s25  ;;  %s1527_s25 = sld [smem:[#allocation9 + $0x3b]] }
  0xfa   : > { %v564_v16 = vmul.f32 %v563_v14, %v2076_v25  ;;  %v618_v17 = vmul.f32 %v617_v15, %v2076_v25  ;;  %v692_v20 = vmul.f32 %v691_v18, %v2076_v25  ;;  %v746_v21 = vmul.f32 %v745_v19, %v2076_v25 }
  0xfb   : > { %v702_v24 = vmul.f32 %v701_v22, %v2076_v25  ;;  %v628_v27 = vmul.f32 %v627_v23, %v2076_v25  ;;  %v711_v28 = vstv %s1497_s28  ;;  %v755_v29 = vstv %s1501_s4  ;;  %v2149_v30 = vld [vmem:[#allocation4] sm:$0x7]  ;;  %s1520_s28 = sld [smem:[#allocation9 + $0x3a]]  ;;  %s1516_s4 = sld [smem:[#allocation9 + $0x4e]] }
  0xfc   : > { %v885_v31 = vstv %s1513_s20  ;;  %v712_v32 = vmul.f32 %v711_v28, %v2076_v25  ;;  %v756_v33 = vmul.f32 %v755_v29, %v2076_v25  ;;  %v637_v34 = vstv %s1490_s10  ;;  %s1521_s20 = sld [smem:[#allocation9 + $0x41]]  ;;  %s1528_s10 = sld [smem:[#allocation9 + $0x42]] }
  0xfd   : > { %452 = vrot.lane.b32.xlu0 %v450_v35, %s1835_s21  ;;  %378 = vrot.lane.b32.xlu1 %v376_v36, %s1835_s21  ;;  %v886_v35 = vmul.f32 %v885_v31, %v2149_v30  ;;  %v895_v36 = vstv %s1514_s18  ;;  %v638_v37 = vmul.f32 %v637_v34, %v2076_v25  ;;  %v765_v38 = vstv %s1502_s19  ;;  %s1522_s18 = sld [smem:[#allocation9 + $0x48]]  ;;  %s1517_s19 = sld [smem:[#allocation9 + $0x55]] }
  0xfe   : > { %v775_v41 = vstv %s1503_s6  ;;  %v905_v42 = vstv %s1515_s8  ;;  %v785_v45 = vstv %s1504_s9  ;;  %s1534_s6 = sld [smem:[#allocation9 + $0x3c]]  ;;  %s1529_s8 = sld [smem:[#allocation9 + $0x49]] }
  0xff   : > { %v1029_v46 = vstv %s1527_s25  ;;  %s1523_s9 = sld [smem:[#allocation9 + $0x4f]]  ;;  %s1541_s25 = sld [smem:[#allocation9 + $0x3d]] }
 0x101   : > { %398 = vrot.lane.b32.xlu0 %v396_v39, %s1836_s22  ;;  %388 = vrot.lane.b32.xlu1 %v386_v40, %s1837_s27  ;;  %v896_v39 = vmul.f32 %v895_v36, %v2149_v30  ;;  %v766_v40 = vmul.f32 %v765_v38, %v2076_v25  ;;  %v957_v49 = vstv %s1520_s28  ;;  %v915_v50 = vstv %s1516_s4  ;;  %s1535_s28 = sld [smem:[#allocation9 + $0x43]]  ;;  %s1524_s4 = sld [smem:[#allocation9 + $0x56]] }
 0x102   : > { %v967_v53 = vstv %s1521_s20  ;;  %v1039_v54 = vstv %s1528_s10  ;;  %s1518_s20 = sld [smem:[#allocation9 + $0x5c]]  ;;  %s1536_s10 = sld [smem:[#allocation9 + $0x4a]] }
 0x103   : > { %v977_v57 = vstv %s1522_s18  ;;  %v925_v58 = vstv %s1517_s19  ;;  %s1530_s18 = sld [smem:[#allocation9 + $0x50]]  ;;  %s1548_s19 = sld [smem:[#allocation9 + $0x3e]] }
 0x104   : > { %v1101_v61 = vstv %s1534_s6  ;;  %v1049_v62 = vstv %s1529_s8  ;;  %s1542_s6 = sld [smem:[#allocation9 + $0x44]]  ;;  %s1531_s8 = sld [smem:[#allocation9 + $0x57]] }
 0x105   : > { %526 = vrot.lane.b32.xlu0 %v524_v43, %s1835_s21  ;;  %516 = vrot.lane.b32.xlu1 %v514_v44, %s1834_s5  ;;  %v776_v43 = vmul.f32 %v775_v41, %v2076_v25  ;;  %v906_v44 = vmul.f32 %v905_v42, %v2149_v30  ;;  %v987_v1 = vstv %s1523_s9  ;;  %v1173_v2 = vstv %s1541_s25  ;;  %s287_s9 = sld [smem:[#allocation9]]  ;;  %s2197_s25 = sld [smem:[#allocation9 + $0x5d]] }
 0x107   : > { %v1111_v5 = vstv %s1535_s28  ;;  %v997_v6 = vstv %s1524_s4  ;;  %s2199_s28 = sld [smem:[#allocation9 + $0x4b]]  ;;  %s2205_s4 = sld [smem:[#allocation9 + $0x51]] }
 0x108   : > { %v935_v9 = vstv %s1518_s20  ;;  %v1121_v11 = vstv %s1536_s10  ;;  %s2207_s20 = sld [smem:[#allocation9 + $0x5e]]  ;;  %s2217_s10 = sld [smem:[#allocation9 + $0x45]] }
 0x109   : > { %408 = vrot.lane.b32.xlu0 %v406_v47, %s1838_s29  ;;  %462 = vrot.lane.b32.xlu1 %v460_v48, %s1837_s27  ;;  %v786_v47 = vmul.f32 %v785_v45, %v2076_v25  ;;  %v1030_v48 = vmul.f32 %v1029_v46, %v2149_v30  ;;  %v1059_v14 = vstv %s1530_s18  ;;  %v1245_v15 = vstv %s1548_s19  ;;  %s2219_s18 = sld [smem:[#allocation9 + $0x52]]  ;;  %s1538_s19 = sld [smem:[#allocation9 + $0x58]] }
 0x10a   : > { %v1183_v18 = vstv %s1542_s6  ;;  %v1069_v19 = vstv %s1531_s8  ;;  %s1539_s6 = sld [smem:[#allocation9 + $0x5f]]  ;;  %s1550_s8 = sld [smem:[#allocation9 + $0x4c]] }
 0x10b   : > { %v1184_v23 = vmul.f32 %v1183_v18, %v2149_v30  ;;  %v1007_v28 = vstv %s2197_s25  ;;  %s1545_s25 = sld [smem:[#allocation9 + $0x59]] }
 0x10c   : > { %v1008_v36 = vmul.f32 %v1007_v28, %v2149_v30 }
 0x10d   : > { %536 = vrot.lane.b32.xlu0 %v534_v51, %s1837_s27  ;;  %590 = vrot.lane.b32.xlu1 %v588_v52, %s1834_s5  ;;  %v958_v51 = vmul.f32 %v957_v49, %v2149_v30  ;;  %v916_v52 = vmul.f32 %v915_v50, %v2149_v30  ;;  %v1193_v29 = vstv %s2199_s28  ;;  %s1552_s28 = sld [smem:[#allocation9 + $0x5a]] }
 0x10e   : > { %v1255_v46 = vstv %s2217_s10  ;;  %s2260_s10 = sld [smem:[#allocation9 + $0x15]] }
 0x10f   : > { %v1256_v50 = vmul.f32 %v1255_v46, %v2149_v30 }
 0x111   : > { %664 = vrot.lane.b32.xlu0 %v662_v55, %s1834_s5  ;;  %472 = vrot.lane.b32.xlu1 %v470_v56, %s1836_s22  ;;  %v968_v55 = vmul.f32 %v967_v53, %v2149_v30  ;;  %v1040_v56 = vmul.f32 %v1039_v54, %v2149_v30  ;;  %v1151_v53 = vstv %s1539_s6  ;;  %s2286_s6 = sld [smem:[#allocation9 + $0x1c]] }
 0x115   : > { %482 = vrot.lane.b32.xlu0 %v480_v59, %s1838_s29  ;;  %600 = vrot.lane.b32.xlu1 %v598_v60, %s1835_s21  ;;  %v978_v59 = vmul.f32 %v977_v57, %v2149_v30  ;;  %v926_v60 = vmul.f32 %v925_v58, %v2149_v30  ;;  %v1152_v57 = vmul.f32 %v1151_v53, %v2149_v30  ;;  %v1265_v58 = vstv %s1550_s8  ;;  %s2292_s8 = sld [smem:[#allocation9 + $0x2]] }
 0x119   : > { %610 = vrot.lane.b32.xlu0 %v608_v63, %s1837_s27  ;;  %418 = vrot.lane.b32.xlu1 %v416_v0, %s1839_s11  ;;  %v1102_v63 = vmul.f32 %v1101_v61, %v2149_v30  ;;  %v1050_v0 = vmul.f32 %v1049_v62, %v2149_v30  ;;  %v1266_v62 = vmul.f32 %v1265_v58, %v2149_v30 }
 0x11d   : > { %738 = vrot.lane.b32.xlu0 %v736_v3, %s1834_s5  ;;  %546 = vrot.lane.b32.xlu1 %v544_v4, %s1836_s22  ;;  %v988_v3 = vmul.f32 %v987_v1, %v2149_v30  ;;  %v1174_v4 = vmul.f32 %v1173_v2, %v2149_v30  ;;  %v1213_v1 = vstv %s1545_s25  ;;  %v1285_v2 = vstv %s1552_s28  ;;  %s2308_s25 = sld [smem:[#allocation9 + $0x3]]  ;;  %s2315_s28 = sld [smem:[#allocation9 + $0x38]] }
 0x121   : > { %556 = vrot.lane.b32.xlu0 %v554_v7, %s1838_s29  ;;  %674 = vrot.lane.b32.xlu1 %v672_v8, %s1835_s21  ;;  %v1112_v7 = vmul.f32 %v1111_v5, %v2149_v30  ;;  %v998_v8 = vmul.f32 %v997_v6, %v2149_v30 }
 0x125   : > { %684 = vrot.lane.b32.xlu0 %v682_v12, %s1837_s27  ;;  %492 = vrot.lane.b32.xlu1 %v490_v13, %s1839_s11  ;;  %v936_v12 = vmul.f32 %v935_v9, %v2149_v30  ;;  %v1122_v13 = vmul.f32 %v1121_v11, %v2149_v30 }
 0x129   : > { %566 = vrot.lane.b32.xlu0 %v564_v16, %s1839_s11  ;;  %620 = vrot.lane.b32.xlu1 %v618_v17, %s1836_s22  ;;  %v1060_v16 = vmul.f32 %v1059_v14, %v2149_v30  ;;  %v1246_v17 = vmul.f32 %v1245_v15, %v2149_v30 }
 0x12d   : > { %694 = vrot.lane.b32.xlu0 %v692_v20, %s1836_s22  ;;  %748 = vrot.lane.b32.xlu1 %v746_v21, %s1835_s21  ;;  %v289_v20 = vstv %s287_s9  ;;  %s1551_s9 = sld [smem:[#allocation9 + $0x53]] }
 0x12e   : > { %v290_v31 = vmul.f32 %v289_v20, %v2078_v26  ;;  %v1079_v26 = vstv %s2207_s20  ;;  %s2258_s20 = sld [smem:[#allocation9 + $0x60]] }
 0x12f   : > { %v1080_v45 = vmul.f32 %v1079_v26, %v2149_v30  ;;  %v436_v26 = vstv %s2292_s8  ;;  %s2387_s8 = sld [smem:[#allocation9 + $0x5b]] }
 0x131   : > { %704 = vrot.lane.b32.xlu0 %v702_v24, %s1838_s29  ;;  %630 = vrot.lane.b32.xlu1 %v628_v27, %s1838_s29  ;;  %v1070_v24 = vmul.f32 %v1069_v19, %v2149_v30 }
 0x135   : > { %714 = vrot.lane.b32.xlu0 %v712_v32, %s1839_s11  ;;  %758 = vrot.lane.b32.xlu1 %v756_v33, %s1837_s27 }
 0x139   : > { %640 = vrot.lane.b32.xlu1 %v638_v37, %s1839_s11  ;;  %888 = vrot.lane.b32.xlu0 %v886_v35, %s1834_s5  ;;  %v1194_v37 = vmul.f32 %v1193_v29, %v2149_v30 }
 0x13d   : > { %768 = vrot.lane.b32.xlu1 %v766_v40, %s1836_s22  ;;  %898 = vrot.lane.b32.xlu0 %v896_v39, %s1835_s21  ;;  %v1131_v39 = vstv %s2205_s4  ;;  %s2250_s4 = sld [smem:[#allocation9 + $0x1]] }
 0x141   : > { %778 = vrot.lane.b32.xlu1 %v776_v43, %s1838_s29  ;;  %908 = vrot.lane.b32.xlu0 %v906_v44, %s1837_s27  ;;  %v1132_v44 = vmul.f32 %v1131_v39, %v2149_v30 }
 0x145   : > { %788 = vrot.lane.b32.xlu1 %v786_v47, %s1839_s11  ;;  %1032 = vrot.lane.b32.xlu0 %v1030_v48, %s1834_s5  ;;  %v1203_v47 = vstv %s2219_s18  ;;  %s2269_s18 = sld [smem:[#allocation9 + $0x61]] }
 0x149   : > { %960 = vrot.lane.b32.xlu1 %v958_v51, %s1834_s5  ;;  %918 = vrot.lane.b32.xlu0 %v916_v52, %s1836_s22  ;;  %v1204_v51 = vmul.f32 %v1203_v47, %v2149_v30  ;;  %v1141_v52 = vstv %s1538_s19  ;;  %s2271_s19 = sld [smem:[#allocation9 + $0x23]] }
 0x14d   : > { %970 = vrot.lane.b32.xlu1 %v968_v55, %s1835_s21  ;;  %1042 = vrot.lane.b32.xlu0 %v1040_v56, %s1835_s21  ;;  %v1142_v56 = vmul.f32 %v1141_v52, %v2149_v30  ;;  %v510_v52 = vstv %s2308_s25  ;;  %s1512_s25 = sld [smem:[#allocation9 + $0x32]] }
 0x151   : > { %980 = vrot.lane.b32.xlu1 %v978_v59, %s1837_s27  ;;  %928 = vrot.lane.b32.xlu0 %v926_v60, %s1838_s29  ;;  %v1275_v59 = vstv %s1551_s9  ;;  %s2303_s9 = sld [smem:[#allocation9 + $0x2a]] }
 0x155   : > { %1104 = vrot.lane.b32.xlu1 %v1102_v63, %s1834_s5  ;;  %1052 = vrot.lane.b32.xlu0 %v1050_v0, %s1837_s27  ;;  %v1276_v63 = vmul.f32 %v1275_v59, %v2149_v30 }
 0x159   : > { %990 = vrot.lane.b32.xlu1 %v988_v3, %s1836_s22  ;;  %1176 = vrot.lane.b32.xlu0 %v1174_v4, %s1834_s5  ;;  %v362_v3 = vstv %s2250_s4  ;;  %s2330_s4 = sld [smem:[#allocation9 + $0x3f]] }
 0x15a   : > { %v363_v14 = vmul.f32 %v362_v3, %v2076_v25  ;;  %v511_v3 = vmul.f32 %v510_v52, %v2076_v25 }
 0x15d   : > { %1114 = vrot.lane.b32.xlu1 %v1112_v7, %s1835_s21  ;;  %1000 = vrot.lane.b32.xlu0 %v998_v8, %s1838_s29  ;;  %v1214_v7 = vmul.f32 %v1213_v1, %v2149_v30  ;;  %v1286_v8 = vmul.f32 %v1285_v2, %v2149_v30  ;;  %v819_v1 = vstv %s2315_s28  ;;  %s1519_s28 = sld [smem:[#allocation9 + $0x33]] }
 0x161   : > { %938 = vrot.lane.b32.xlu1 %v936_v12, %s1839_s11  ;;  %1124 = vrot.lane.b32.xlu0 %v1122_v13, %s1837_s27  ;;  %v1223_v12 = vstv %s2258_s20  ;;  %v315_v13 = vstv %s2260_s10  ;;  %s2348_s20 = sld [smem:[#allocation9 + $0x46]]  ;;  %s1840_s10 = smov 127  }
 0x162   : > { %v1224_v19 = vmul.f32 %v1223_v12, %v2149_v30  ;;  %v316_v20 = vmul.f32 %v315_v13, %v2076_v25  ;;  %v820_v13 = vmul.f32 %v819_v1, %v2149_v30 }
 0x165   : > { %1062 = vrot.lane.b32.xlu1 %v1060_v16, %s1836_s22  ;;  %1248 = vrot.lane.b32.xlu0 %v1246_v17, %s1834_s5 }
 0x167   : > { %v297_v21 = vpop.permute.xlu1 %296  ;;  %v2211_v22 = vpop.permute.xlu0 %368 }
 0x168   : > { %v298_v27 = vrot.slane %v297_v21, 1  ;;  %v370_v0 = vrot.slane %v2211_v22, 1 }
 0x169   : > { %1186 = vrot.lane.b32.xlu1 %v1184_v23, %s1835_s21  ;;  %1072 = vrot.lane.b32.xlu0 %v1070_v24, %s1838_s29  ;;  %v337_v23 = vstv %s2271_s19  ;;  %s2374_s19 = sld [smem:[#allocation9 + $0x4]] }
 0x16a   : > { %v300_v32 = vsel %vm299_vm6, %v297_v21, %v298_v27  ;;  %v371_v9 = vsel %vm299_vm6, %v2211_v22, %v370_v0  ;;  %v1295_v22 = vstv %s2269_s18  ;;  %s2363_s18 = sld [smem:[#allocation9 + $0x4d]] }
 0x16b   : > { %v302_v33 = vadd.f32 %v300_v32, %v290_v31  ;;  %v308_v34 = vpop.permute.xlu1 %307  ;;  %v2225_v35 = vpop.permute.xlu0 %442  ;;  %v373_v16 = vadd.f32 %v371_v9, %v363_v14 }
 0x16c   : > { %v309_v38 = vrot.slane %v308_v34, 1 }
 0x16d   : > { %1010 = vrot.lane.b32.xlu1 %v1008_v36, %s1839_s11  ;;  %1196 = vrot.lane.b32.xlu0 %v1194_v37, %s1837_s27  ;;  %v326_v36 = vstv %s2286_s6  ;;  %v444_v37 = vrot.slane %v2225_v35, 1  ;;  %s2383_s6 = sld [smem:[#allocation9 + $0x5]] }
 0x16e   : > { %v311_v40 = vsel %vm310_vm7, %v308_v34, %v309_v38  ;;  %v338_v34 = vmul.f32 %v337_v23, %v2076_v25 }
 0x16f   : > { %v2234_v41 = vadd.f32 %v311_v40, %v302_v33  ;;  %v379_v42 = vpop.permute.xlu1 %378  ;;  %v2236_v43 = vpop.permute.xlu0 %452  ;;  %v1296_v33 = vmul.f32 %v1295_v22, %v2149_v30 }
 0x170   : > { %v380_v4 = vrot.slane %v379_v42, 1  ;;  %v454_v46 = vrot.slane %v2236_v43, 1 }
 0x171   : > { %1134 = vrot.lane.b32.xlu1 %v1132_v44, %s1836_s22  ;;  %1082 = vrot.lane.b32.xlu0 %v1080_v45, %s1839_s11  ;;  %v327_v45 = vmul.f32 %v326_v36, %v2076_v25 }
 0x172   : > { %v381_v15 = vsel %vm310_vm7, %v379_v42, %v380_v4 }
 0x173   : > { %v389_v48 = vpop.permute.xlu1 %388  ;;  %v2244_v49 = vpop.permute.xlu0 %398  ;;  %v383_v24 = vadd.f32 %v381_v15, %v373_v16  ;;  %v829_v16 = vstv %s2330_s4  ;;  %s2458_s4 = sld [smem:[#allocation9 + $0x34]] }
 0x174   : > { %v390_v11 = vrot.slane %v389_v48, 1  ;;  %v400_v27 = vrot.slane %v2244_v49, 1 }
 0x175   : > { %1258 = vrot.lane.b32.xlu1 %v1256_v50, %s1835_s21  ;;  %1206 = vrot.lane.b32.xlu0 %v1204_v51, %s1836_s22  ;;  %v348_v50 = vstv %s2303_s9  ;;  %v445_v51 = vsel %vm299_vm6, %v2225_v35, %v444_v37  ;;  %s2407_s9 = sld [smem:[#allocation9 + $0x6]] }
 0x176   : > { %v391_v21 = vsel %vm321_vm8, %v389_v48, %v390_v11  ;;  %v401_v38 = vsel %vm332_vm9, %v2244_v49, %v400_v27 }
 0x177   : > { %v2252_v54 = vpop.permute.xlu1 %516  ;;  %v2254_v55 = vpop.permute.xlu0 %526  ;;  %v393_v29 = vadd.f32 %v391_v21, %v383_v24 }
 0x178   : > { %v518_v47 = vrot.slane %v2252_v54, 1  ;;  %v528_v4 = vrot.slane %v2254_v55, 1 }
 0x179   : > { %1144 = vrot.lane.b32.xlu1 %v1142_v56, %s1838_s29  ;;  %1154 = vrot.lane.b32.xlu0 %v1152_v57, %s1839_s11  ;;  %v403_v40 = vadd.f32 %v401_v38, %v393_v29  ;;  %v437_v57 = vmul.f32 %v436_v26, %v2076_v25 }
 0x17a   : > { %v519_v0 = vsel %vm299_vm6, %v2252_v54, %v518_v47 }
 0x17b   : > { %v2264_v60 = vpop.permute.xlu1 %462  ;;  %v409_v61 = vpop.permute.xlu0 %408  ;;  %v447_v2 = vadd.f32 %v445_v51, %v437_v57  ;;  %v521_v9 = vadd.f32 %v519_v0, %v511_v3  ;;  %v658_v0 = vstv %s2383_s6  ;;  %s1561_s6 = sshll.u32 %s1819_s15, 5  ;;  %s1846_s15 = smov [#allocation12]  }
 0x17c   : > { %v410_v28 = vrot.slane %v409_v61, 1  ;;  %v464_v53 = vrot.slane %v2264_v60, 1 }
 0x17d   : > { %1268 = vrot.lane.b32.xlu1 %v1266_v62, %s1837_s27  ;;  %1278 = vrot.lane.b32.xlu0 %v1276_v63, %s1836_s22  ;;  %v349_v62 = vmul.f32 %v348_v50, %v2076_v25  ;;  %v455_v63 = vsel %vm310_vm7, %v2236_v43, %v454_v46 }
 0x17e   : > { %v411_v39 = vsel %vm343_vm10, %v409_v61, %v410_v28  ;;  %v465_v43 = vsel %vm321_vm8, %v2264_v60, %v464_v53  ;;  %v529_v60 = vsel %vm310_vm7, %v2254_v55, %v528_v4  ;;  %v830_v28 = vmul.f32 %v829_v16, %v2149_v30 }
 0x17f   : > { %v2276_v5 = vpop.permute.xlu1 %590  ;;  %v2278_v6 = vpop.permute.xlu0 %536  ;;  %v413_v49 = vadd.f32 %v411_v39, %v403_v40  ;;  %v531_v23 = vadd.f32 %v529_v60, %v521_v9  ;;  %v839_v55 = vstv %s2348_s20  ;;  %v584_v53 = vstv %s2374_s19  ;;  %s2474_s20 = sld [smem:[#allocation9 + $0x35]]  ;;  %s1505_s19 = sld [smem:[#allocation9 + $0x31]] }
 0x180   : > { %v538_v54 = vrot.slane %v2278_v6, 1  ;;  %v840_v40 = vmul.f32 %v839_v55, %v2149_v30  ;;  %v592_v47 = vrot.slane %v2276_v5, 1 }
 0x181   : > { %1216 = vrot.lane.b32.xlu1 %v1214_v7, %s1838_s29  ;;  %1288 = vrot.lane.b32.xlu0 %v1286_v8, %s1838_s29  ;;  %v457_v8 = vadd.f32 %v455_v63, %v447_v2  ;;  %v585_v63 = vmul.f32 %v584_v53, %v2076_v25 }
 0x183   : > { %v2294_v17 = vpop.permute.xlu1 %472  ;;  %v2296_v18 = vpop.permute.xlu0 %664 }
 0x184   : > { %v474_v35 = vrot.slane %v2294_v17, 1 }
 0x185   : > { %1226 = vrot.lane.b32.xlu1 %v1224_v19, %s1839_s11  ;;  %318 = vrot.lane.b32.xlu0 %v316_v20, %s1837_s27  ;;  %v467_v19 = vadd.f32 %v465_v43, %v457_v8  ;;  %v539_v20 = vsel %vm321_vm8, %v2278_v6, %v538_v54 }
 0x186   : > { %v475_v14 = vsel %vm332_vm9, %v2294_v17, %v474_v35  ;;  %v541_v6 = vadd.f32 %v539_v20, %v531_v23 }
 0x187   : > { %v2310_v31 = vpop.permute.xlu1 %600  ;;  %v483_v32 = vpop.permute.xlu0 %482  ;;  %v477_v24 = vadd.f32 %v475_v14, %v467_v19 }
 0x188   : > { %v484_v7 = vrot.slane %v483_v32, 1 }
 0x189   : > { %1298 = vrot.lane.b32.xlu1 %v1296_v33, %s1839_s11  ;;  %340 = vrot.lane.b32.xlu0 %v338_v34, %s1838_s29 }
 0x18a   : > { %v485_v21 = vsel %vm343_vm10, %v483_v32, %v484_v7 }
 0x18b   : > { %v419_v42 = vpop.permute.xlu1 %418  ;;  %v2324_v44 = vpop.permute.xlu0 %610  ;;  %v487_v34 = vadd.f32 %v485_v21, %v477_v24 }
 0x18c   : > { %v420_v48 = vrot.slane %v419_v42, 1 }
 0x18d   : > { %329 = vrot.lane.b32.xlu1 %v327_v45, %s1836_s22  ;;  %v849_v45 = vstv %s2363_s18  ;;  %s2496_s18 = sld [smem:[#allocation9 + $0x37]] }
 0x18e   : > { %v421_v56 = vsel %vm354_vm11, %v419_v42, %v420_v48  ;;  %v850_v52 = vmul.f32 %v849_v45, %v2149_v30 }
 0x18f   : > { %v423_v58 = vadd.f32 %v421_v56, %v413_v49  ;;  %v547_v59 = vpop.permute.xlu1 %546  ;;  %v2339_v61 = vpop.permute.xlu0 %738  ;;  %v602_v56 = vrot.slane %v2310_v31, 1 }
 0x190   : > { %v548_v15 = vrot.slane %v547_v59, 1 }
 0x191   : > { %351 = vrot.lane.b32.xlu1 %v349_v62, %s1839_s11  ;;  %427 = vrot.lane.b32.xlu0 %v423_v58, %s1840_s10  ;;  %v593_v58 = vsel %vm299_vm6, %v2276_v5, %v592_v47  ;;  %v612_v62 = vrot.slane %v2324_v44, 1  ;;  %v603_v3 = vsel %vm310_vm7, %v2310_v31, %v602_v56  ;;  %v869_v5 = vstv %s2387_s8 }
 0x192   : > { %v549_v29 = vsel %vm332_vm9, %v547_v59, %v548_v15  ;;  %v666_v59 = vrot.slane %v2296_v18, 1  ;;  %v595_v54 = vadd.f32 %v593_v58, %v585_v63  ;;  %v870_v16 = vmul.f32 %v869_v5, %v2149_v30 }
 0x193   : > { %v2357_v11 = vpop.permute.xlu1 %674  ;;  %v557_v12 = vpop.permute.xlu0 %556  ;;  %v551_v37 = vadd.f32 %v549_v29, %v541_v6  ;;  %v613_v8 = vsel %vm321_vm8, %v2324_v44, %v612_v62  ;;  %v740_v44 = vrot.slane %v2339_v61, 1 }
 0x194   : > { %v558_v22 = vrot.slane %v557_v12, 1  ;;  %v676_v4 = vrot.slane %v2357_v11, 1  ;;  %v667_v7 = vsel %vm299_vm6, %v2296_v18, %v666_v59  ;;  %v605_v31 = vadd.f32 %v603_v3, %v595_v54 }
 0x195   : > { %822 = vrot.lane.b32.xlu1 %v820_v13, %s1834_s5  ;;  %s2378_s5 = sld [smem:[#allocation9 + $0x54]]  ;;  %v659_v13 = vmul.f32 %v658_v0, %v2076_v25 }
 0x196   : > { %v559_v32 = vsel %vm343_vm10, %v557_v12, %v558_v22  ;;  %v677_v19 = vsel %vm310_vm7, %v2357_v11, %v676_v4  ;;  %v615_v21 = vadd.f32 %v613_v8, %v605_v31 }
 0x197   : > { %v493_v17 = vpop.permute.xlu1 %492  ;;  %v2371_v27 = vpop.permute.xlu0 %684  ;;  %v561_v46 = vadd.f32 %v559_v32, %v551_v37  ;;  %v669_v20 = vadd.f32 %v667_v7, %v659_v13 }
 0x198   : > { %v494_v33 = vrot.slane %v493_v17, 1  ;;  %v686_v9 = vrot.slane %v2371_v27, 1 }
 0x199   : > { %832 = vrot.lane.b32.xlu1 %v830_v28, %s1835_s21  ;;  %s1841_s21 = smov 126   ;;  %v679_v28 = vadd.f32 %v677_v19, %v669_v20 }
 0x19a   : > { %v495_v36 = vsel %vm354_vm11, %v493_v17, %v494_v33  ;;  %v687_v22 = vsel %vm321_vm8, %v2371_v27, %v686_v9  ;;  %v732_v17 = vstv %s2407_s9 }
 0x19b   : > { %v497_v38 = vadd.f32 %v495_v36, %v487_v34  ;;  %v621_v39 = vpop.permute.xlu1 %620  ;;  %v567_v26 = vpop.permute.xlu0 %566  ;;  %v859_v57 = vstv %s2378_s5  ;;  %v689_v36 = vadd.f32 %v687_v22, %v679_v28  ;;  %s1453_s5 = sshll.u32 %s2033_s24, 1 }
 0x19c   : > { %v568_v42 = vrot.slane %v567_v26, 1  ;;  %v860_v2 = vmul.f32 %v859_v57, %v2149_v30  ;;  %v622_v43 = vrot.slane %v621_v39, 1  ;;  %s229_s8 = scalar_lea.vmem [#allocation12], %s1453_s5 }
 0x19d   : > { %842 = vrot.lane.b32.xlu1 %v840_v40, %s1837_s27  ;;  %501 = vrot.lane.b32.xlu0 %v497_v38, %s1841_s21  ;;  %s1842_s27 = smov 125   ;;  %v741_v38 = vsel %vm299_vm6, %v2339_v61, %v740_v44  ;;  %v733_v40 = vmul.f32 %v732_v17, %v2076_v25 }
 0x19e   : > { %v569_v48 = vsel %vm354_vm11, %v567_v26, %v568_v42  ;;  %v623_v60 = vsel %vm332_vm9, %v621_v39, %v622_v43 }
 0x19f   : > { %v571_v50 = vadd.f32 %v569_v48, %v561_v46  ;;  %v2393_v49 = vpop.permute.xlu1 %748  ;;  %v695_v51 = vpop.permute.xlu0 %694  ;;  %v625_v29 = vadd.f32 %v623_v60, %v615_v21 }
 0x1a0   : > { %v696_v18 = vrot.slane %v695_v51, 1  ;;  %v750_v55 = vrot.slane %v2393_v49, 1 }
 0x1a1   : > { %852 = vrot.lane.b32.xlu1 %v850_v52, %s1836_s22  ;;  %575 = vrot.lane.b32.xlu0 %v571_v50, %s1842_s27  ;;  %v743_v52 = vadd.f32 %v741_v38, %v733_v40  ;;  %s1843_s22 = smov 124   ;;  %v954_v38 = vstv %s1519_s28 }
 0x1a2   : > { %v697_v6 = vsel %vm332_vm9, %v695_v51, %v696_v18  ;;  %v751_v48 = vsel %vm310_vm7, %v2393_v49, %v750_v55 }
 0x1a3   : > { %v631_v35 = vpop.permute.xlu1 %630  ;;  %v705_v1 = vpop.permute.xlu0 %704  ;;  %v699_v42 = vadd.f32 %v697_v6, %v689_v36  ;;  %v753_v56 = vadd.f32 %v751_v48, %v743_v52  ;;  %v1026_v52 = vstv %s2458_s4 }
 0x1a4   : > { %v632_v12 = vrot.slane %v631_v35, 1  ;;  %v706_v24 = vrot.slane %v705_v1, 1 }
 0x1a5   : > { %862 = vrot.lane.b32.xlu1 %v860_v2, %s1838_s29  ;;  %s1844_s29 = smov 123  }
 0x1a6   : > { %v633_v23 = vsel %vm343_vm10, %v631_v35, %v632_v12  ;;  %v707_v27 = vsel %vm343_vm10, %v705_v1, %v706_v24 }
 0x1a7   : > { %v759_v14 = vpop.permute.xlu1 %758  ;;  %v715_v15 = vpop.permute.xlu0 %714  ;;  %v635_v37 = vadd.f32 %v633_v23, %v625_v29  ;;  %v709_v53 = vadd.f32 %v707_v27, %v699_v42 }
 0x1a8   : > { %v716_v34 = vrot.slane %v715_v15, 1  ;;  %v760_v39 = vrot.slane %v759_v14, 1 }
 0x1a9   : > { %872 = vrot.lane.b32.xlu1 %v870_v16, %s1839_s11  ;;  %s1845_s11 = smov 122  }
 0x1aa   : > { %v717_v50 = vsel %vm354_vm11, %v715_v15, %v716_v34  ;;  %v761_v61 = vsel %vm321_vm8, %v759_v14, %v760_v39  ;;  %v882_v15 = vstv %s1512_s25  ;;  %s1741_s25 = sshll.u32 %s1846_s15, 4  ;;  %s1742_s25 = int_to_ptr.vmem [resolvable:$false] %s1741_s25 }
 0x1ab   : > { %v641_v33 = vpop.permute.xlu1 %640  ;;  %v889_v11 = vpop.permute.xlu0 %888  ;;  %v719_v57 = vadd.f32 %v717_v50, %v709_v53  ;;  %v763_v63 = vadd.f32 %v761_v61, %v753_v56  ;;  %v883_v18 = vmul.f32 %v882_v15, %v2149_v30  ;;  %s1743_s28 = scalar_lea.vmem %s1742_s25, 64 }
 0x1ac   : > { %v642_v32 = vrot.slane %v641_v33, 1  ;;  %v890_v13 = vrot.slane %v889_v11, 1 }
 0x1ae   : > { %v643_v26 = vsel %vm354_vm11, %v641_v33, %v642_v32  ;;  %v891_v19 = vsel %vm299_vm6, %v889_v11, %v890_v13 }
 0x1af   : > { %v645_v45 = vadd.f32 %v643_v26, %v635_v37  ;;  %v769_v46 = vpop.permute.xlu1 %768  ;;  %v899_v47 = vpop.permute.xlu0 %898  ;;  %v893_v23 = vadd.f32 %v891_v19, %v883_v18 }
 0x1b0   : > { %v770_v51 = vrot.slane %v769_v46, 1  ;;  %v900_v16 = vrot.slane %v899_v47, 1 }
 0x1b1   : > { %649 = vrot.lane.b32.xlu0 %v645_v45, %s1843_s22 }
 0x1b2   : > { %v771_v59 = vsel %vm332_vm9, %v769_v46, %v770_v51  ;;  %v901_v44 = vsel %vm310_vm7, %v899_v47, %v900_v16  ;;  %v955_v47 = vmul.f32 %v954_v38, %v2149_v30 }
 0x1b3   : > { %v779_v25 = vpop.permute.xlu1 %778  ;;  %v909_v58 = vpop.permute.xlu0 %908  ;;  %v773_v0 = vadd.f32 %v771_v59, %v763_v63  ;;  %v903_v28 = vadd.f32 %v901_v44, %v893_v23  ;;  %v1027_v63 = vmul.f32 %v1026_v52, %v2149_v30 }
 0x1b4   : > { %v780_v62 = vrot.slane %v779_v25, 1  ;;  %v910_v60 = vrot.slane %v909_v58, 1 }
 0x1b5   : > { %723 = vrot.lane.b32.xlu0 %v719_v57, %s1844_s29 }
 0x1b6   : > { %v781_v49 = vsel %vm343_vm10, %v779_v25, %v780_v62  ;;  %v911_v24 = vsel %vm321_vm8, %v909_v58, %v910_v60 }
 0x1b7   : > { %v789_v35 = vpop.permute.xlu1 %788  ;;  %v1033_v1 = vpop.permute.xlu0 %1032  ;;  %v783_v3 = vadd.f32 %v781_v49, %v773_v0  ;;  %v913_v55 = vadd.f32 %v911_v24, %v903_v28 }
 0x1b8   : > { %v790_v2 = vrot.slane %v789_v35, 1  ;;  %v1034_v40 = vrot.slane %v1033_v1, 1 }
 0x1ba   : > { %v791_v4 = vsel %vm354_vm11, %v789_v35, %v790_v2  ;;  %v1035_v25 = vsel %vm299_vm6, %v1033_v1, %v1034_v40 }
 0x1bb   : > { %v793_v43 = vadd.f32 %v791_v4, %v783_v3  ;;  %v961_v5 = vpop.permute.xlu1 %960  ;;  %v919_v54 = vpop.permute.xlu0 %918 }
 0x1bc   : > { %v920_v22 = vrot.slane %v919_v54, 1  ;;  %v962_v6 = vrot.slane %v961_v5, 1 }
 0x1bd   : > { %797 = vrot.lane.b32.xlu0 %v793_v43, %s1845_s11  ;;  %v1037_v43 = vadd.f32 %v1035_v25, %v1027_v63  ;;  %v1663_v63 = vld [vmem:[#allocation4] sm:$0x7] }
 0x1be   : > { %v921_v11 = vsel %vm332_vm9, %v919_v54, %v920_v22  ;;  %v963_v42 = vsel %vm299_vm6, %v961_v5, %v962_v6 }
 0x1bf   : > { %v971_v7 = vpop.permute.xlu1 %970  ;;  %v1043_v8 = vpop.permute.xlu0 %1042  ;;  %v923_v32 = vadd.f32 %v921_v11, %v913_v55  ;;  %v965_v57 = vadd.f32 %v963_v42, %v955_v47 }
 0x1c0   : > { %v972_v27 = vrot.slane %v971_v7, 1  ;;  %v1044_v61 = vrot.slane %v1043_v8, 1 }
 0x1c2   : > { %v973_v53 = vsel %vm310_vm7, %v971_v7, %v972_v27  ;;  %v1045_v2 = vsel %vm310_vm7, %v1043_v8, %v1044_v61 }
 0x1c3   : > { %v981_v9 = vpop.permute.xlu1 %980  ;;  %v929_v12 = vpop.permute.xlu0 %928  ;;  %v975_v49 = vadd.f32 %v973_v53, %v965_v57  ;;  %v1242_v53 = vstv %s2496_s18 }
 0x1c4   : > { %v930_v17 = vrot.slane %v929_v12, 1  ;;  %v982_v45 = vrot.slane %v981_v9, 1 }
 0x1c6   : > { %v931_v34 = vsel %vm343_vm10, %v929_v12, %v930_v17  ;;  %v983_v58 = vsel %vm321_vm8, %v981_v9, %v982_v45  ;;  %v1047_v9 = vadd.f32 %v1045_v2, %v1037_v43 }
 0x1c7   : > { %v2448_v31 = vpop.permute.xlu1 %1104  ;;  %v1053_v14 = vpop.permute.xlu0 %1052  ;;  %v933_v26 = vadd.f32 %v931_v34, %v923_v32  ;;  %v985_v1 = vadd.f32 %v983_v58, %v975_v49 }
 0x1c8   : > { %v1054_v59 = vrot.slane %v1053_v14, 1  ;;  %v1106_v16 = vrot.slane %v2448_v31, 1 }
 0x1ca   : > { %v1055_v5 = vsel %vm321_vm8, %v1053_v14, %v1054_v59 }
 0x1cb   : > { %v991_v20 = vpop.permute.xlu1 %990  ;;  %v2452_v21 = vpop.permute.xlu0 %1176  ;;  %v1057_v60 = vadd.f32 %v1055_v5, %v1047_v9 }
 0x1cc   : > { %v992_v56 = vrot.slane %v991_v20, 1 }
 0x1ce   : > { %v993_v3 = vsel %vm332_vm9, %v991_v20, %v992_v56  ;;  %v1098_v20 = vstv %s2474_s20 }
 0x1cf   : > { %v2456_v29 = vpop.permute.xlu1 %1114  ;;  %v1001_v33 = vpop.permute.xlu0 %1000  ;;  %v995_v12 = vadd.f32 %v993_v3, %v985_v1  ;;  %v1099_v6 = vmul.f32 %v1098_v20, %v2149_v30  ;;  %v1178_v30 = vrot.slane %v2452_v21, 1 }
 0x1d0   : > { %v1002_v62 = vrot.slane %v1001_v33, 1  ;;  %v1116_v44 = vrot.slane %v2456_v29, 1 }
 0x1d1   : > { %v1179_v25 = vsel %vm299_vm6, %v2452_v21, %v1178_v30 }
 0x1d2   : > { %v1003_v54 = vsel %vm343_vm10, %v1001_v33, %v1002_v62  ;;  %v1107_v33 = vsel %vm299_vm6, %v2448_v31, %v1106_v16  ;;  %v1117_v32 = vsel %vm310_vm7, %v2456_v29, %v1116_v44 }
 0x1d3   : > { %v939_v36 = vpop.permute.xlu1 %938  ;;  %v2462_v37 = vpop.permute.xlu0 %1124  ;;  %v1005_v18 = vadd.f32 %v1003_v54, %v995_v12  ;;  %v1109_v27 = vadd.f32 %v1107_v33, %v1099_v6 }
 0x1d4   : > { %v940_v39 = vrot.slane %v939_v36, 1  ;;  %v1126_v11 = vrot.slane %v2462_v37, 1 }
 0x1d5   : > { %v1119_v42 = vadd.f32 %v1117_v32, %v1109_v27 }
 0x1d6   : > { %v941_v46 = vsel %vm354_vm11, %v939_v36, %v940_v39  ;;  %v1127_v40 = vsel %vm321_vm8, %v2462_v37, %v1126_v11 }
 0x1d7   : > { %v943_v48 = vadd.f32 %v941_v46, %v933_v26  ;;  %v1063_v50 = vpop.permute.xlu1 %1062  ;;  %v2467_v51 = vpop.permute.xlu0 %1248  ;;  %v1129_v47 = vadd.f32 %v1127_v40, %v1119_v42 }
 0x1d8   : > { %v1064_v4 = vrot.slane %v1063_v50, 1  ;;  %v1250_v45 = vrot.slane %v2467_v51, 1 }
 0x1d9   : > { %946 = vrot.lane.b32.xlu0 %v943_v48, %s1840_s10  ;;  %s2491_s10 = sld [smem:[#allocation9 + $0x36]] }
 0x1da   : > { %v1065_v8 = vsel %vm332_vm9, %v1063_v50, %v1064_v4  ;;  %v1251_v58 = vsel %vm299_vm6, %v2467_v51, %v1250_v45 }
 0x1db   : > { %v2477_v0 = vpop.permute.xlu1 %1186  ;;  %v1073_v35 = vpop.permute.xlu0 %1072  ;;  %v1067_v23 = vadd.f32 %v1065_v8, %v1057_v60 }
 0x1dc   : > { %v1074_v7 = vrot.slane %v1073_v35, 1  ;;  %v1188_v48 = vrot.slane %v2477_v0, 1 }
 0x1de   : > { %v1075_v14 = vsel %vm343_vm10, %v1073_v35, %v1074_v7  ;;  %v1243_v35 = vmul.f32 %v1663_v63, %v1242_v53  ;;  %v1189_v2 = vsel %vm310_vm7, %v2477_v0, %v1188_v48 }
 0x1df   : > { %v1011_v13 = vpop.permute.xlu1 %1010  ;;  %v2483_v15 = vpop.permute.xlu0 %1196  ;;  %v1077_v34 = vadd.f32 %v1075_v14, %v1067_v23  ;;  %v1170_v46 = vstv %s2491_s10 }
 0x1e0   : > { %v1012_v19 = vrot.slane %v1011_v13, 1  ;;  %v1198_v59 = vrot.slane %v2483_v15, 1  ;;  %v1171_v49 = vmul.f32 %v1663_v63, %v1170_v46  ;;  %v1253_v7 = vadd.f32 %v1251_v58, %v1243_v35 }
 0x1e2   : > { %v1013_v22 = vsel %vm354_vm11, %v1011_v13, %v1012_v19  ;;  %v1181_v51 = vadd.f32 %v1179_v25, %v1171_v49  ;;  %v1199_v12 = vsel %vm321_vm8, %v2483_v15, %v1198_v59 }
 0x1e3   : > { %v1015_v24 = vadd.f32 %v1013_v22, %v1005_v18  ;;  %v1135_v17 = vpop.permute.xlu1 %1134  ;;  %v1083_v28 = vpop.permute.xlu0 %1082 }
 0x1e4   : > { %v1084_v55 = vrot.slane %v1083_v28, 1  ;;  %v1136_v36 = vrot.slane %v1135_v17, 1  ;;  %v1191_v16 = vadd.f32 %v1189_v2, %v1181_v51 }
 0x1e5   : > { %1018 = vrot.lane.b32.xlu1 %v1015_v24, %s1841_s21  ;;  %s1337_s21 = sshll.u32 %s229_s8, 4  ;;  %s2564_s21 = int_to_ptr.vmem [resolvable:$true] %s1337_s21 }
 0x1e6   : > { %v1085_v38 = vsel %vm354_vm11, %v1083_v28, %v1084_v55  ;;  %v1137_v29 = vsel %vm332_vm9, %v1135_v17, %v1136_v36  ;;  %v1201_v44 = vadd.f32 %v1199_v12, %v1191_v16  ;;  %v499_v16 = vld [vmem:[#allocation10 + $0x2] ss:$8 sm:$0x3]  ;;  %p1744_p0 = scmp.lt.s32.totalorder %s2564_s21, %s1742_s25 }
 0x1e7   : > { %v1087_v31 = vadd.f32 %v1085_v38, %v1077_v34  ;;  %v1259_v39 = vpop.permute.xlu1 %1258  ;;  %v1207_v26 = vpop.permute.xlu0 %1206  ;;  %v1139_v37 = vadd.f32 %v1137_v29, %v1129_v47 }
 0x1e8   : > { %v1260_v61 = vrot.slane %v1259_v39, 1  ;;  %v1208_v5 = vrot.slane %v1207_v26, 1 }
 0x1e9   : > { %1090 = vrot.lane.b32.xlu0 %v1087_v31, %s1842_s27 }
 0x1ea   : > { %v1261_v1 = vsel %vm310_vm7, %v1259_v39, %v1260_v61  ;;  %v1209_v60 = vsel %vm332_vm9, %v1207_v26, %v1208_v5  ;;  %v358_v5 = vld [vmem:[#allocation10] ss:$8 sm:$0x3] }
 0x1eb   : > { %v1145_v50 = vpop.permute.xlu1 %1144  ;;  %v1155_v52 = vpop.permute.xlu0 %1154  ;;  %v1263_v8 = vadd.f32 %v1261_v1, %v1253_v7  ;;  %v1211_v24 = vadd.f32 %v1209_v60, %v1201_v44  ;;  %v425_v7 = vld [vmem:[#allocation10 + $0x1] ss:$8 sm:$0x3] }
 0x1ec   : > { %v1146_v56 = vrot.slane %v1145_v50, 1  ;;  %v1156_v57 = vrot.slane %v1155_v52, 1 }
 0x1ee   : > { %v1147_v62 = vsel %vm343_vm10, %v1145_v50, %v1146_v56  ;;  %v1157_v21 = vsel %vm354_vm11, %v1155_v52, %v1156_v57 }
 0x1ef   : > { %v1149_v3 = vadd.f32 %v1147_v62, %v1139_v37  ;;  %v1269_v4 = vpop.permute.xlu1 %1268  ;;  %v1279_v43 = vpop.permute.xlu0 %1278 }
 0x1f0   : > { %v1270_v54 = vrot.slane %v1269_v4, 1  ;;  %v1280_v18 = vrot.slane %v1279_v43, 1 }
 0x1f1   : > { %v1159_v9 = vadd.f32 %v1157_v21, %v1149_v3  ;;  %v815_v21 = vstv %s1505_s19 }
 0x1f2   : > { %v1271_v13 = vsel %vm321_vm8, %v1269_v4, %v1270_v54  ;;  %v1281_v15 = vsel %vm332_vm9, %v1279_v43, %v1280_v18  ;;  %v814_v43 = vld [vmem:[#allocation4] sm:$0x3] }
 0x1f3   : > { %v1217_v0 = vpop.permute.xlu1 %1216  ;;  %1162 = vrot.lane.b32.xlu1 %v1159_v9, %s1843_s22  ;;  %v1289_v19 = vpop.permute.xlu0 %1288  ;;  %v1273_v14 = vadd.f32 %v1271_v13, %v1263_v8  ;;  %v816_v60 = vmul.f32 %v815_v21, %v814_v43  ;;  %s2562_s22 = scalar_lea.hbm %s2616_s3, %s1561_s6 }
 0x1f4   : > { %v1218_v20 = vrot.slane %v1217_v0, 1  ;;  %v1290_v23 = vrot.slane %v1289_v19, 1 }
 0x1f5   : > { %v1283_v33 = vadd.f32 %v1281_v15, %v1273_v14  ;;  %v573_v14 = vld [vmem:[#allocation10 + $0x3] ss:$8 sm:$0x3] }
 0x1f6   : > { %v1219_v22 = vsel %vm343_vm10, %v1217_v0, %v1218_v20  ;;  %v1291_v55 = vsel %vm343_vm10, %v1289_v19, %v1290_v23 }
 0x1f7   : > { %v1227_v17 = vpop.permute.xlu1 %1226  ;;  %v1221_v11 = vadd.f32 %v1219_v22, %v1211_v24  ;;  %v1293_v38 = vadd.f32 %v1291_v55, %v1283_v33  ;;  %v319_v26 = vpop.permute.xlu0 %318  ;;  %v647_v55 = vld [vmem:[#allocation10 + $0x4] ss:$8 sm:$0x3] }
 0x1f8   : > { %v1228_v28 = vrot.slane %v1227_v17, 1  ;;  %v320_v46 = vrot.slane %v319_v26, 1 }
 0x1fa   : > { %v1229_v6 = vsel %vm354_vm11, %v1227_v17, %v1228_v28  ;;  %v322_v50 = vsel %vm321_vm8, %v319_v26, %v320_v46  ;;  %v795_v46 = vld [vmem:[#allocation10 + $0x6] ss:$8 sm:$0x3] }
 0x1fb   : > { %v1231_v34 = vadd.f32 %v1229_v6, %v1221_v11  ;;  %v1299_v32 = vpop.permute.xlu1 %1298  ;;  %v341_v42 = vpop.permute.xlu0 %340  ;;  %v324_v61 = vadd.f32 %v322_v50, %v2234_v41 }
 0x1fc   : > { %v1300_v36 = vrot.slane %v1299_v32, 1  ;;  %v342_v57 = vrot.slane %v341_v42, 1 }
 0x1fd   : > { %1234 = vrot.lane.b32.xlu0 %v1231_v34, %s1844_s29  ;;  %s1323_s29 = scalar_lea.sflag [#allocation7], %s2033_s24 }
 0x1fe   : > { %v1301_v27 = vsel %vm354_vm11, %v1299_v32, %v1300_v36  ;;  %v344_v62 = vsel %vm343_vm10, %v341_v42, %v342_v57 }
 0x1ff   : > { %v1303_v31 = vadd.f32 %v1301_v27, %v1293_v38  ;;  %v330_v39 = vpop.permute.xlu1 %329 }
 0x200   : > { %v331_v48 = vrot.slane %v330_v39, 1 }
 0x201   : > { %1306 = vrot.lane.b32.xlu1 %v1303_v31, %s1845_s11  ;;  %s1737_s11 = scalar_lea.vmem %s2564_s21, 32 }
 0x202   : > { %v333_v53 = vsel %vm332_vm9, %v330_v39, %v331_v48  ;;  %v721_v39 = vld [vmem:[#allocation10 + $0x5] ss:$8 sm:$0x3]  ;;  %p1738_p8 = scmp.ne.s32.totalorder %s2564_s21, %s1737_s11  ;;  %p1745_p6 = scmp.lt.s32.totalorder %s1743_s28, %s1737_s11 }
 0x203   : > { %v352_v40 = vpop.permute.xlu1 %351  ;;  %v428_v45 = vpop.permute.xlu0 %427  ;;  %v335_v37 = vadd.f32 %v333_v53, %v324_v61 }
 0x204   : > { %v353_v25 = vrot.slane %v352_v40, 1  ;;  %v429_v35 = vrot.slane %v428_v45, 1  ;;  %p1739_p10 = pnand %p1738_p8, %p2637_p2  ;;  %p1746_p3 = por %p1745_p6, %p1744_p0 }
 0x205   : > { %v346_v63 = vadd.f32 %v344_v62, %v335_v37  ;;  %v878_v62 = vld [vmem:[#allocation10] ss:$8 sm:$0x3] }
 0x206   : > { %v355_v49 = vsel %vm354_vm11, %v352_v40, %v353_v25  ;;  %v431_v9 = vsel %vm430_vm12, %v428_v45, %v429_v35  ;;  %p1740_p13 = pneg %p1739_p10 }
 0x207   : > { %v823_v30 = vpop.permute.xlu1 %822  ;;  %v357_v4 = vadd.f32 %v355_v49, %v346_v63  ;;  %v433_v24 = vmul.f32 %v431_v9, %v425_v7 }
 0x208   : > { %v824_v2 = vrot.slane %v823_v30, 1  ;;  %p1747_p11 = pnand %p1746_p3, %p1740_p13 }
 0x209   : > { %v359_v19 = vmul.f32 %v358_v5, %v357_v4 }
 0x20a   : > { %v825_v12 = vsel %vm299_vm6, %v823_v30, %v824_v2  ;;  %v944_v2 = vld [vmem:[#allocation10 + $0x1] ss:$8 sm:$0x3] }
 0x20b   : > { %v833_v29 = vpop.permute.xlu1 %832  ;;  %v827_v17 = vadd.f32 %v825_v12, %v816_v60  ;;  %v434_v32 = vadd.f32 %v433_v24, %v359_v19  ;;  %v1232_v60 = vld [vmem:[#allocation10 + $0x5] ss:$8 sm:$0x3] }
 0x20c   : > { %v834_v54 = vrot.slane %v833_v29, 1 }
 0x20e   : > { %v835_v20 = vsel %vm310_vm7, %v833_v29, %v834_v54 }
 0x20f   : > { %v502_v47 = vpop.permute.xlu0 %501  ;;  %v843_v52 = vpop.permute.xlu1 %842  ;;  %v837_v36 = vadd.f32 %v835_v20, %v827_v17  ;;  %v1304_v17 = vld [vmem:[#allocation10 + $0x6] ss:$8 sm:$0x3] }
 0x210   : > { %v503_v3 = vrot.slane %v502_v47, 1  ;;  %v844_v13 = vrot.slane %v843_v52, 1 }
 0x212   : > { %v505_v8 = vsel %vm504_vm13, %v502_v47, %v503_v3  ;;  %v845_v33 = vsel %vm321_vm8, %v843_v52, %v844_v13  ;;  %v1160_v13 = vld [vmem:[#allocation10 + $0x4] ss:$8 sm:$0x3] }
 0x213   : > { %v576_v56 = vpop.permute.xlu0 %575  ;;  %v853_v58 = vpop.permute.xlu1 %852  ;;  %v507_v15 = vmul.f32 %v505_v8, %v499_v16  ;;  %v847_v40 = vadd.f32 %v845_v33, %v837_v36 }
 0x214   : > { %v577_v51 = vrot.slane %v576_v56, 1  ;;  %v854_v44 = vrot.slane %v853_v58, 1 }
 0x215   : > { %v508_v42 = vadd.f32 %v507_v15, %v434_v32 }
 0x216   : > { %v579_v22 = vsel %vm578_vm14, %v576_v56, %v577_v51  ;;  %v855_v27 = vsel %vm332_vm9, %v853_v58, %v854_v44  ;;  %v1088_v51 = vld [vmem:[#allocation10 + $0x3] ss:$8 sm:$0x3] }
 0x217   : > { %v863_v41 = vpop.permute.xlu1 %862  ;;  %v581_v38 = vmul.f32 %v579_v22, %v573_v14  ;;  %v857_v48 = vadd.f32 %v855_v27, %v847_v40 }
 0x218   : > { %v864_v11 = vrot.slane %v863_v41, 1 }
 0x219   : > { %v582_v50 = vadd.f32 %v581_v38, %v508_v42 }
 0x21a   : > { %v865_v29 = vsel %vm343_vm10, %v863_v41, %v864_v11  ;;  %v1016_v41 = vld [vmem:[#allocation10 + $0x2] ss:$8 sm:$0x3] }
 0x21b   : > { %v873_v28 = vpop.permute.xlu1 %872  ;;  %v867_v57 = vadd.f32 %v865_v29, %v857_v48 }
 0x21c   : > { %v874_v31 = vrot.slane %v873_v28, 1 }
 0x21e   : > { %v875_v61 = vsel %vm354_vm11, %v873_v28, %v874_v31 }
 0x21f   : > { %v877_v63 = vadd.f32 %v875_v61, %v867_v57 }
 0x221   : > { %v879_v21 = vmul.f32 %v878_v62, %v877_v63 }
 0x223   : > { %v650_v59 = vpop.permute.xlu0 %649 }
 0x224   : > { %v651_v0 = vrot.slane %v650_v59, 1 }
 0x226   : > { %v653_v6 = vsel %vm652_vm15, %v650_v59, %v651_v0 }
 0x227   : > { %v724_v1 = vpop.permute.xlu0 %723  ;;  %v655_v30 = vmul.f32 %v653_v6, %v647_v55 }
 0x228   : > { %v725_v23 = vrot.slane %v724_v1, 1 }
 0x229   : > { %v656_v37 = vadd.f32 %v655_v30, %v582_v50 }
 0x22a   : > { %v727_v26 = vsel %vm726_vm0, %v724_v1, %v725_v23 }
 0x22b   : > { %v729_v52 = vmul.f32 %v727_v26, %v721_v39 }
 0x22d   : > { %v730_v49 = vadd.f32 %v729_v52, %v656_v37 }
 0x22f   : > { %v798_v18 = vpop.permute.xlu0 %797 }
 0x230   : > { %v799_v34 = vrot.slane %v798_v18, 1 }
 0x232   : > { %v801_v47 = vsel %vm800_vm2, %v798_v18, %v799_v34 }
 0x233   : > { %v803_v25 = vmul.f32 %v801_v47, %v795_v46 }
 0x235   : > { %v804_v43 = vadd.f32 %v803_v25, %v730_v49 }
 0x237   : > { %v880_v9 = vadd.f32 %v879_v21, %v804_v43 }
 0x24b   : > { %v947_v45 = vpop.permute.xlu0 %946 }
 0x24c   : > { %v948_v56 = vrot.slane %v947_v45, 1 }
 0x24e   : > { %v949_v3 = vsel %vm430_vm12, %v947_v45, %v948_v56 }
 0x24f   : > { %v951_v54 = vmul.f32 %v949_v3, %v944_v2 }
 0x251   : > { %v952_v8 = vadd.f32 %v951_v54, %v880_v9 }
 0x257   : > { %v1019_v53 = vpop.permute.xlu1 %1018 }
 0x258   : > { %v1020_v59 = vrot.slane %v1019_v53, 1 }
 0x25a   : > { %v1021_v1 = vsel %vm504_vm13, %v1019_v53, %v1020_v59 }
 0x25b   : > { %v1091_v58 = vpop.permute.xlu0 %1090  ;;  %v1023_v12 = vmul.f32 %v1021_v1, %v1016_v41 }
 0x25c   : > { %v1092_v4 = vrot.slane %v1091_v58, 1 }
 0x25d   : > { %v1024_v20 = vadd.f32 %v1023_v12, %v952_v8 }
 0x25e   : > { %v1093_v7 = vsel %vm578_vm14, %v1091_v58, %v1092_v4 }
 0x25f   : > { %v1095_v0 = vmul.f32 %v1093_v7, %v1088_v51 }
 0x261   : > { %v1096_v22 = vadd.f32 %v1095_v0, %v1024_v20 }
 0x265   : > { %v1163_v35 = vpop.permute.xlu1 %1162 }
 0x266   : > { %v1164_v5 = vrot.slane %v1163_v35, 1 }
 0x268   : > { %v1165_v16 = vsel %vm652_vm15, %v1163_v35, %v1164_v5 }
 0x269   : > { %v1167_v44 = vmul.f32 %v1165_v16, %v1160_v13 }
 0x26b   : > { %v1168_v28 = vadd.f32 %v1167_v44, %v1096_v22 }
 0x26f   : > { %v1235_v19 = vpop.permute.xlu0 %1234 }
 0x270   : > { %v1236_v18 = vrot.slane %v1235_v19, 1 }
 0x272   : > { %v1237_v14 = vsel %vm726_vm0, %v1235_v19, %v1236_v18 }
 0x273   : > { %v1239_v23 = vmul.f32 %v1237_v14, %v1232_v60  ;;  %v1307_v24 = vpop.permute.xlu1 %1306 }
 0x274   : > { %v1308_v15 = vrot.slane %v1307_v24, 1 }
 0x275   : > { %v1240_v11 = vadd.f32 %v1239_v23, %v1168_v28 }
 0x276   : > { %v1309_v33 = vsel %vm800_vm2, %v1307_v24, %v1308_v15 }
 0x277   : > { %v1311_v55 = vmul.f32 %v1309_v33, %v1304_v17 }
 0x279   : > { %v1312_v6 = vadd.f32 %v1311_v55, %v1240_v11 }
 0x27b   : > { %v1554_v34 = vmul.f32 -1.442695, %v1312_v6 }
 0x27d   : > { %1659 = vpow2.f32 %v1554_v34 }
 0x287   : > { %v1660_v32 = vpop.eup %1659 }
 0x288   : > { %v1316_v36 = vadd.f32 1.0, %v1660_v32 }
 0x28a   : > { %1661 = vrcp.f32 %v1316_v36 }
 0x294   : > { %v1662_v38 = vpop.eup %1661 }
 0x295   : > { %1321 = vst.msk [vmem:[%s229_s8] sm:$0x3] %vm2049_vm1, %v1662_v38 }
 0x296   : > { %1750 = shalt.err (!%p1747_p11)
}
 0x297   : > { %s1751_s24 = scalar_lea.hbm %s2562_s22, 32  ;;  %s1755_s10 = scalar_lea.hbm %s2616_s3, 64 }
 0x298   : > { %p1752_p7 = scmp.ne.s32.totalorder %s2562_s22, %s1751_s24  ;;  %p1756_p4 = scmp.lt.u32.totalorder %s2562_s22, %s2616_s3 }
 0x299   : > { %p1757_p9 = scmp.lt.u32.totalorder %s1755_s10, %s1751_s24  ;;  %p1759_p8 = scmp.lt.u32.totalorder %s1751_s24, %s2562_s22 }
 0x29a   : > { %p1753_p12 = pnand %p1752_p7, %p2637_p2 }
 0x29b   : > { %p1758_p5 = por %p1757_p9, %p1756_p4 }
 0x29c   : > { %p1754_p1 = pneg %p1753_p12 }
 0x29d   : > { %p1760_p10 = por %p1759_p8, %p1758_p5 }
 0x29f   : > { %p1761_p13 = pnand %p1760_p10, %p1754_p1 }
 0x2a1   : > { %1764 = shalt.err (!%p1761_p13)
}
 0x2a2   : > { %1572 = dma.vmem_to_hbm [thread:$0]  (%p2637_p2), %s2564_s21, 32, %s2562_s22, %s1323_s29  }
 0x2a3 PF: > { %s1349_s5 = sand.u32 1, %s1807_s12   ;;  %p2638_p0 = scmp.ne.s32.totalorder %s2624_s23, 0 }
 0x2a4   : > { %p2639_p6 = scmp.ge.s32.totalorder %s1827_s17, 2  ;;  %s1350_s6 = scalar_lea.sflag [#allocation7], %s1349_s5 }
 0x2a6   : > { %p1586_p3 = pnand %p2639_p6, %p2638_p0 }
 0x2a8   : > { %1802 = dma.done.wait (!%p1586_p3), %s1350_s6, 32  }
 0x2a9   : > { %1804 = vsyncadd (!%p1586_p3), %s1350_s6, 4294967264  ;;  %s21_s17 = sadd.s32 1, %s1827_s17   ;;  %s2640_s12 = smov %s1811_s13 }
 0x2aa   : > { %p18_p11 = scmp.ge.s32.totalorder %s21_s17, 4   ;;  %s2641_s13 = smov %s1815_s14 }
 0x2ab   : > { %s2642_s14 = smov %s1990_s7  ;;  %s2643_s15 = smov %s1823_s16 }
 0x2ac   : > { %s2644_s16 = smov %s2646_s26  ;;  %20 = sbr.rel (!%p18_p11) target bundleno = 8 (0x8), region = 107 }
 0x2b3   :  { %1355 = vsyncpa [#allocation6], 1 }
 0x2b4   :  { %1357 = vsyncpa [#allocation6 + $0x1], 1 }
 0x2b5   :  { %1358 = vsyncpa [#allocation11], 1 }
 0x2b6   :  { %1359 = vsyncpa [#allocation7], 1 }
 0x2b7   :  { %1361 = vsyncpa [#allocation7 + $0x1], 1 }
 0x2b8   :  { %1362 = vsyncpa [#allocation8], 1 }
 0x2b9   :  { %1364 = vsyncpa [#allocation8 + $0x1], 1 }

</bundles_post_ra>
